<compile_context>
chip_gen: v7x
topology: tpu7x:2x2x1
jax: 0.10.0
libtpu: 0.0.40
codegen_flags: <defaults>
</compile_context>

<pallas_src>
import math
import functools

import jax
import jax.numpy as jnp
from jax.experimental import pallas as pl
from jax.experimental.pallas import tpu as pltpu


def _make_kernel(Cin, Cout, KH, KW, TH, W, p, neg_slope=0.01):
    """Kernel for one (image, H-tile) grid step.

    xp_ref: (1, 1, Cin, TH+2p, W+2p)  VMEM  padded/haloed input tile
    w_ref : (Cout*Cin*KH*KW,)         SMEM  flat conv weights (OIHW order)
    b_ref : (Cout,)                   SMEM  bias
    o_ref : (1, Cout, TH, W)          VMEM  output tile (NCHW layout)
    """

    def kernel(xp_ref, w_ref, b_ref, o_ref):
        # Accumulators initialized with the bias (saves a full add sweep).
        accs = [jnp.full((TH, W), b_ref[co], jnp.float32) for co in range(Cout)]

        for ci in range(Cin):
            xc = xp_ref[0, 0, ci]                      # (TH+2p, W+2p), one load per ci
            for kh in range(KH):
                for kw in range(KW):
                    # Shifted window shared across all output channels.
                    sh = xc[kh:kh + TH, kw:kw + W]     # (TH, W)
                    for co in range(Cout):
                        w = w_ref[((co * Cin + ci) * KH + kh) * KW + kw]
                        accs[co] = accs[co] + w * sh   # VPU FMA, W on lane axis

        for co in range(Cout):
            y = accs[co]
            y = jnp.where(y >= 0, y, neg_slope * y)                # LeakyReLU(0.01)
            # Residual = center of the padded tile (same bytes as original x).
            y = y + xp_ref[0, 0, co, p:p + TH, p:p + W].astype(jnp.float32)
            o_ref[0, co] = y.astype(o_ref.dtype)

    return kernel


def _pick_tile_h(H, W, Cin, Cout, p, budget_bytes=12 << 20):
    """Largest H tile (multiple of 8 dividing H, or H itself) fitting VMEM budget."""
    def lane_pad(n):
        return ((n + 127) // 128) * 128

    cands = [d for d in range(8, H + 1, 8) if H % d == 0]
    if H not in cands:
        cands.append(H)
    cands = sorted(set(cands), reverse=True)
    for th in cands:
        thp = th + 2 * p
        in_b = 2 * Cin * thp * lane_pad(W + 2 * p) * 4   # double-buffered input tile
        out_b = 2 * Cout * th * lane_pad(W) * 4          # double-buffered output tile
        if in_b + out_b <= budget_bytes:
            return th
    return cands[-1]


@functools.partial(jax.jit, static_argnames=("padding", "tile_h"))
def conv_block2(x_nchw, weight_oihw, bias, padding, tile_h=None):
    """out = LeakyReLU(conv2d(x, w, b, padding)) + x   (NCHW in / NCHW out)."""
    N, Cin, H, W = x_nchw.shape
    Cout, Cin_w, KH, KW = weight_oihw.shape
    p = padding

    assert Cin == Cin_w and Cout == Cin, "residual add needs Cout == Cin"
    # "same" conv check: otherwise the residual add / cropped output silently
    # diverges from the PyTorch semantics.
    assert KH == KW and 2 * p == KH - 1, "requires 'same' conv: 2*padding == K-1"

    if tile_h is None:
        tile_h = _pick_tile_h(H, W, Cin, Cout, p)
    TH = tile_h
    assert H % TH == 0 and (TH % 8 == 0 or TH == H), \
        "tile_h must divide H and be a multiple of 8 (or equal H)"
    nTH = H // TH
    THp = TH + 2 * p
    Wp = W + 2 * p

    # --- glue (plain JAX): zero-pad spatially and build a haloed H-tile view
    # so every BlockSpec stays plain Blocked (no overlapping-block index maps).
    x_pad = jnp.pad(x_nchw, ((0, 0), (0, 0), (p, p), (p, p)))        # (N,C,Hp,Wp)
    x_tiles = jnp.stack(
        [x_pad[:, :, t * TH: t * TH + THp, :] for t in range(nTH)],
        axis=1)                                                      # (N,nTH,C,THp,Wp)

    w_flat = weight_oihw.reshape(-1)                                 # (Cout*Cin*KH*KW,)
    b_flat = bias.reshape(-1)                                        # (Cout,)

    kernel = _make_kernel(Cin, Cout, KH, KW, TH, W, p)

    out = pl.pallas_call(
        kernel,
        out_shape=jax.ShapeDtypeStruct((N, Cout, H, W), x_nchw.dtype),
        grid=(N, nTH),
        in_specs=[
            # Haloed input tile: one DMA per (image, H-tile); the residual is
            # read from its center, so no separate residual input is needed.
            pl.BlockSpec((1, 1, Cin, THp, Wp), lambda n, t: (n, t, 0, 0, 0)),
            # Weights / bias as SMEM scalar tables: constant across the grid,
            # no double-buffered VMEM copies.
            pl.BlockSpec(memory_space=pltpu.MemorySpace.SMEM),
            pl.BlockSpec(memory_space=pltpu.MemorySpace.SMEM),
        ],
        out_specs=pl.BlockSpec((1, Cout, TH, W), lambda n, t: (n, 0, t, 0)),
        compiler_params=pltpu.CompilerParams(
            dimension_semantics=("parallel", "parallel"),
            vmem_limit_bytes=32 * 1024 * 1024,
        ),
    )(x_tiles, w_flat, b_flat)

    return out                                                       # already NCHW


def _init_params(key, in_c, out_c, k):
    """Deterministic init matching Conv2d_init.reset_parameters shapes/dists."""
    kw_key, kb_key = jax.random.split(key)
    fan_in = in_c * k * k
    fan_out = out_c * k * k
    std = math.sqrt(2.0 / (fan_in + fan_out))                        # xavier_normal_
    weight = std * jax.random.normal(kw_key, (out_c, in_c, k, k), jnp.float32)
    bound = 1.0 / math.sqrt(fan_in)
    bias = jax.random.uniform(kb_key, (out_c,), jnp.float32, -bound, bound)
    return weight, bias


def _reference(x_nchw, weight, bias, padding):
    """Pure-JAX reference (NCHW conv + LeakyReLU + residual)."""
    y = jax.lax.conv_general_dilated(
        x_nchw, weight, window_strides=(1, 1),
        padding=((padding, padding), (padding, padding)),
        dimension_numbers=("NCHW", "OIHW", "NCHW"))
    y = y + bias.reshape(1, -1, 1, 1)
    y = jnp.where(y >= 0, y, 0.01 * y)
    return y + x_nchw


if __name__ == "__main__":
    key = jax.random.PRNGKey(0)
    kx, kp = jax.random.split(key)

    N, C, H, W = 2, 4, 16, 16        # in_chanels == out_chanels == 4
    K, PAD = 3, 1                    # kernel_size=3, padding=1 ("same")

    x = jax.random.normal(kx, (N, C, H, W), jnp.float32)
    weight, bias = _init_params(kp, C, C, K)

    # tile_h=8 -> grid (N=2, H/TH=2): exercises the haloed H-tiling path.
    out = conv_block2(x, weight, bias, PAD, tile_h=8)
    out = jax.block_until_ready(out)

    ref = jax.block_until_ready(_reference(x, weight, bias, PAD))
    assert out.shape == (N, C, H, W)
    assert jnp.allclose(out, ref, atol=1e-4, rtol=1e-4), "mismatch vs reference"

    print("KERNEL_OK")
</pallas_src>

<mosaic_0001>
module attributes {stable_mosaic.version = 11 : i64} {
  func.func @kernel(%arg0: i32, %arg1: i32, %arg2: memref<1x1x4x10x18xf32, #tpu.memory_space<vmem>>, %arg3: memref<144xf32, #tpu.memory_space<smem>>, %arg4: memref<4xf32, #tpu.memory_space<smem>>, %arg5: memref<1x4x8x16xf32, #tpu.memory_space<vmem>>) attributes {dimension_semantics = [#tpu.dimension_semantics<parallel>, #tpu.dimension_semantics<parallel>], iteration_bounds = array<i64: 2, 2>, scalar_prefetch = 0 : i64, scratch_operands = 0 : i64, tpu.core_type = #tpu.core_type<tc>, window_params = [{transform_indices = @transform_0, window_bounds = array<i64: 1, 1, 4, 10, 18>}, {transform_indices = @transform_1, window_bounds = array<i64: 144>}, {transform_indices = @transform_2, window_bounds = array<i64: 4>}, {transform_indices = @transform_3, window_bounds = array<i64: 1, 4, 8, 16>}]} {
    %c0 = arith.constant 0 : index
    %0 = memref.load %arg4[%c0] : memref<4xf32, #tpu.memory_space<smem>>
    %1 = vector.broadcast %0 : f32 to vector<8x16xf32>
    %c1 = arith.constant 1 : index
    %2 = memref.load %arg4[%c1] : memref<4xf32, #tpu.memory_space<smem>>
    %3 = vector.broadcast %2 : f32 to vector<8x16xf32>
    %c2 = arith.constant 2 : index
    %4 = memref.load %arg4[%c2] : memref<4xf32, #tpu.memory_space<smem>>
    %5 = vector.broadcast %4 : f32 to vector<8x16xf32>
    %c3 = arith.constant 3 : index
    %6 = memref.load %arg4[%c3] : memref<4xf32, #tpu.memory_space<smem>>
    %7 = vector.broadcast %6 : f32 to vector<8x16xf32>
    %c0_0 = arith.constant 0 : index
    %c0_1 = arith.constant 0 : index
    %c0_2 = arith.constant 0 : index
    %c0_3 = arith.constant 0 : index
    %c0_4 = arith.constant 0 : index
    %8 = vector.load %arg2[%c0_0, %c0_1, %c0_2, %c0_3, %c0_4] : memref<1x1x4x10x18xf32, #tpu.memory_space<vmem>>, vector<1x1x1x10x18xf32>
    %9 = vector.shape_cast %8 : vector<1x1x1x10x18xf32> to vector<10x18xf32>
    %10 = vector.extract_strided_slice %9 {offsets = [0, 0], sizes = [8, 16], strides = [1, 1]} : vector<10x18xf32> to vector<8x16xf32>
    %c0_5 = arith.constant 0 : index
    %11 = memref.load %arg3[%c0_5] : memref<144xf32, #tpu.memory_space<smem>>
    %12 = vector.broadcast %11 : f32 to vector<8x16xf32>
    %13 = arith.mulf %12, %10 : vector<8x16xf32>
    %14 = arith.addf %1, %13 : vector<8x16xf32>
    %c36 = arith.constant 36 : index
    %15 = memref.load %arg3[%c36] : memref<144xf32, #tpu.memory_space<smem>>
    %16 = vector.broadcast %15 : f32 to vector<8x16xf32>
    %17 = arith.mulf %16, %10 : vector<8x16xf32>
    %18 = arith.addf %3, %17 : vector<8x16xf32>
    %c72 = arith.constant 72 : index
    %19 = memref.load %arg3[%c72] : memref<144xf32, #tpu.memory_space<smem>>
    %20 = vector.broadcast %19 : f32 to vector<8x16xf32>
    %21 = arith.mulf %20, %10 : vector<8x16xf32>
    %22 = arith.addf %5, %21 : vector<8x16xf32>
    %c108 = arith.constant 108 : index
    %23 = memref.load %arg3[%c108] : memref<144xf32, #tpu.memory_space<smem>>
    %24 = vector.broadcast %23 : f32 to vector<8x16xf32>
    %25 = arith.mulf %24, %10 : vector<8x16xf32>
    %26 = arith.addf %7, %25 : vector<8x16xf32>
    %27 = vector.extract_strided_slice %9 {offsets = [0, 1], sizes = [8, 16], strides = [1, 1]} : vector<10x18xf32> to vector<8x16xf32>
    %c1_6 = arith.constant 1 : index
    %28 = memref.load %arg3[%c1_6] : memref<144xf32, #tpu.memory_space<smem>>
    %29 = vector.broadcast %28 : f32 to vector<8x16xf32>
    %30 = arith.mulf %29, %27 : vector<8x16xf32>
    %31 = arith.addf %14, %30 : vector<8x16xf32>
    %c37 = arith.constant 37 : index
    %32 = memref.load %arg3[%c37] : memref<144xf32, #tpu.memory_space<smem>>
    %33 = vector.broadcast %32 : f32 to vector<8x16xf32>
    %34 = arith.mulf %33, %27 : vector<8x16xf32>
    %35 = arith.addf %18, %34 : vector<8x16xf32>
    %c73 = arith.constant 73 : index
    %36 = memref.load %arg3[%c73] : memref<144xf32, #tpu.memory_space<smem>>
    %37 = vector.broadcast %36 : f32 to vector<8x16xf32>
    %38 = arith.mulf %37, %27 : vector<8x16xf32>
    %39 = arith.addf %22, %38 : vector<8x16xf32>
    %c109 = arith.constant 109 : index
    %40 = memref.load %arg3[%c109] : memref<144xf32, #tpu.memory_space<smem>>
    %41 = vector.broadcast %40 : f32 to vector<8x16xf32>
    %42 = arith.mulf %41, %27 : vector<8x16xf32>
    %43 = arith.addf %26, %42 : vector<8x16xf32>
    %44 = vector.extract_strided_slice %9 {offsets = [0, 2], sizes = [8, 16], strides = [1, 1]} : vector<10x18xf32> to vector<8x16xf32>
    %c2_7 = arith.constant 2 : index
    %45 = memref.load %arg3[%c2_7] : memref<144xf32, #tpu.memory_space<smem>>
    %46 = vector.broadcast %45 : f32 to vector<8x16xf32>
    %47 = arith.mulf %46, %44 : vector<8x16xf32>
    %48 = arith.addf %31, %47 : vector<8x16xf32>
    %c38 = arith.constant 38 : index
    %49 = memref.load %arg3[%c38] : memref<144xf32, #tpu.memory_space<smem>>
    %50 = vector.broadcast %49 : f32 to vector<8x16xf32>
    %51 = arith.mulf %50, %44 : vector<8x16xf32>
    %52 = arith.addf %35, %51 : vector<8x16xf32>
    %c74 = arith.constant 74 : index
    %53 = memref.load %arg3[%c74] : memref<144xf32, #tpu.memory_space<smem>>
    %54 = vector.broadcast %53 : f32 to vector<8x16xf32>
    %55 = arith.mulf %54, %44 : vector<8x16xf32>
    %56 = arith.addf %39, %55 : vector<8x16xf32>
    %c110 = arith.constant 110 : index
    %57 = memref.load %arg3[%c110] : memref<144xf32, #tpu.memory_space<smem>>
    %58 = vector.broadcast %57 : f32 to vector<8x16xf32>
    %59 = arith.mulf %58, %44 : vector<8x16xf32>
    %60 = arith.addf %43, %59 : vector<8x16xf32>
    %61 = vector.extract_strided_slice %9 {offsets = [1, 0], sizes = [8, 16], strides = [1, 1]} : vector<10x18xf32> to vector<8x16xf32>
    %c3_8 = arith.constant 3 : index
    %62 = memref.load %arg3[%c3_8] : memref<144xf32, #tpu.memory_space<smem>>
    %63 = vector.broadcast %62 : f32 to vector<8x16xf32>
    %64 = arith.mulf %63, %61 : vector<8x16xf32>
    %65 = arith.addf %48, %64 : vector<8x16xf32>
    %c39 = arith.constant 39 : index
    %66 = memref.load %arg3[%c39] : memref<144xf32, #tpu.memory_space<smem>>
    %67 = vector.broadcast %66 : f32 to vector<8x16xf32>
    %68 = arith.mulf %67, %61 : vector<8x16xf32>
    %69 = arith.addf %52, %68 : vector<8x16xf32>
    %c75 = arith.constant 75 : index
    %70 = memref.load %arg3[%c75] : memref<144xf32, #tpu.memory_space<smem>>
    %71 = vector.broadcast %70 : f32 to vector<8x16xf32>
    %72 = arith.mulf %71, %61 : vector<8x16xf32>
    %73 = arith.addf %56, %72 : vector<8x16xf32>
    %c111 = arith.constant 111 : index
    %74 = memref.load %arg3[%c111] : memref<144xf32, #tpu.memory_space<smem>>
    %75 = vector.broadcast %74 : f32 to vector<8x16xf32>
    %76 = arith.mulf %75, %61 : vector<8x16xf32>
    %77 = arith.addf %60, %76 : vector<8x16xf32>
    %78 = vector.extract_strided_slice %9 {offsets = [1, 1], sizes = [8, 16], strides = [1, 1]} : vector<10x18xf32> to vector<8x16xf32>
    %c4 = arith.constant 4 : index
    %79 = memref.load %arg3[%c4] : memref<144xf32, #tpu.memory_space<smem>>
    %80 = vector.broadcast %79 : f32 to vector<8x16xf32>
    %81 = arith.mulf %80, %78 : vector<8x16xf32>
    %82 = arith.addf %65, %81 : vector<8x16xf32>
    %c40 = arith.constant 40 : index
    %83 = memref.load %arg3[%c40] : memref<144xf32, #tpu.memory_space<smem>>
    %84 = vector.broadcast %83 : f32 to vector<8x16xf32>
    %85 = arith.mulf %84, %78 : vector<8x16xf32>
    %86 = arith.addf %69, %85 : vector<8x16xf32>
    %c76 = arith.constant 76 : index
    %87 = memref.load %arg3[%c76] : memref<144xf32, #tpu.memory_space<smem>>
    %88 = vector.broadcast %87 : f32 to vector<8x16xf32>
    %89 = arith.mulf %88, %78 : vector<8x16xf32>
    %90 = arith.addf %73, %89 : vector<8x16xf32>
    %c112 = arith.constant 112 : index
    %91 = memref.load %arg3[%c112] : memref<144xf32, #tpu.memory_space<smem>>
    %92 = vector.broadcast %91 : f32 to vector<8x16xf32>
    %93 = arith.mulf %92, %78 : vector<8x16xf32>
    %94 = arith.addf %77, %93 : vector<8x16xf32>
    %95 = vector.extract_strided_slice %9 {offsets = [1, 2], sizes = [8, 16], strides = [1, 1]} : vector<10x18xf32> to vector<8x16xf32>
    %c5 = arith.constant 5 : index
    %96 = memref.load %arg3[%c5] : memref<144xf32, #tpu.memory_space<smem>>
    %97 = vector.broadcast %96 : f32 to vector<8x16xf32>
    %98 = arith.mulf %97, %95 : vector<8x16xf32>
    %99 = arith.addf %82, %98 : vector<8x16xf32>
    %c41 = arith.constant 41 : index
    %100 = memref.load %arg3[%c41] : memref<144xf32, #tpu.memory_space<smem>>
    %101 = vector.broadcast %100 : f32 to vector<8x16xf32>
    %102 = arith.mulf %101, %95 : vector<8x16xf32>
    %103 = arith.addf %86, %102 : vector<8x16xf32>
    %c77 = arith.constant 77 : index
    %104 = memref.load %arg3[%c77] : memref<144xf32, #tpu.memory_space<smem>>
    %105 = vector.broadcast %104 : f32 to vector<8x16xf32>
    %106 = arith.mulf %105, %95 : vector<8x16xf32>
    %107 = arith.addf %90, %106 : vector<8x16xf32>
    %c113 = arith.constant 113 : index
    %108 = memref.load %arg3[%c113] : memref<144xf32, #tpu.memory_space<smem>>
    %109 = vector.broadcast %108 : f32 to vector<8x16xf32>
    %110 = arith.mulf %109, %95 : vector<8x16xf32>
    %111 = arith.addf %94, %110 : vector<8x16xf32>
    %112 = vector.extract_strided_slice %9 {offsets = [2, 0], sizes = [8, 16], strides = [1, 1]} : vector<10x18xf32> to vector<8x16xf32>
    %c6 = arith.constant 6 : index
    %113 = memref.load %arg3[%c6] : memref<144xf32, #tpu.memory_space<smem>>
    %114 = vector.broadcast %113 : f32 to vector<8x16xf32>
    %115 = arith.mulf %114, %112 : vector<8x16xf32>
    %116 = arith.addf %99, %115 : vector<8x16xf32>
    %c42 = arith.constant 42 : index
    %117 = memref.load %arg3[%c42] : memref<144xf32, #tpu.memory_space<smem>>
    %118 = vector.broadcast %117 : f32 to vector<8x16xf32>
    %119 = arith.mulf %118, %112 : vector<8x16xf32>
    %120 = arith.addf %103, %119 : vector<8x16xf32>
    %c78 = arith.constant 78 : index
    %121 = memref.load %arg3[%c78] : memref<144xf32, #tpu.memory_space<smem>>
    %122 = vector.broadcast %121 : f32 to vector<8x16xf32>
    %123 = arith.mulf %122, %112 : vector<8x16xf32>
    %124 = arith.addf %107, %123 : vector<8x16xf32>
    %c114 = arith.constant 114 : index
    %125 = memref.load %arg3[%c114] : memref<144xf32, #tpu.memory_space<smem>>
    %126 = vector.broadcast %125 : f32 to vector<8x16xf32>
    %127 = arith.mulf %126, %112 : vector<8x16xf32>
    %128 = arith.addf %111, %127 : vector<8x16xf32>
    %129 = vector.extract_strided_slice %9 {offsets = [2, 1], sizes = [8, 16], strides = [1, 1]} : vector<10x18xf32> to vector<8x16xf32>
    %c7 = arith.constant 7 : index
    %130 = memref.load %arg3[%c7] : memref<144xf32, #tpu.memory_space<smem>>
    %131 = vector.broadcast %130 : f32 to vector<8x16xf32>
    %132 = arith.mulf %131, %129 : vector<8x16xf32>
    %133 = arith.addf %116, %132 : vector<8x16xf32>
    %c43 = arith.constant 43 : index
    %134 = memref.load %arg3[%c43] : memref<144xf32, #tpu.memory_space<smem>>
    %135 = vector.broadcast %134 : f32 to vector<8x16xf32>
    %136 = arith.mulf %135, %129 : vector<8x16xf32>
    %137 = arith.addf %120, %136 : vector<8x16xf32>
    %c79 = arith.constant 79 : index
    %138 = memref.load %arg3[%c79] : memref<144xf32, #tpu.memory_space<smem>>
    %139 = vector.broadcast %138 : f32 to vector<8x16xf32>
    %140 = arith.mulf %139, %129 : vector<8x16xf32>
    %141 = arith.addf %124, %140 : vector<8x16xf32>
    %c115 = arith.constant 115 : index
    %142 = memref.load %arg3[%c115] : memref<144xf32, #tpu.memory_space<smem>>
    %143 = vector.broadcast %142 : f32 to vector<8x16xf32>
    %144 = arith.mulf %143, %129 : vector<8x16xf32>
    %145 = arith.addf %128, %144 : vector<8x16xf32>
    %146 = vector.extract_strided_slice %9 {offsets = [2, 2], sizes = [8, 16], strides = [1, 1]} : vector<10x18xf32> to vector<8x16xf32>
    %c8 = arith.constant 8 : index
    %147 = memref.load %arg3[%c8] : memref<144xf32, #tpu.memory_space<smem>>
    %148 = vector.broadcast %147 : f32 to vector<8x16xf32>
    %149 = arith.mulf %148, %146 : vector<8x16xf32>
    %150 = arith.addf %133, %149 : vector<8x16xf32>
    %c44 = arith.constant 44 : index
    %151 = memref.load %arg3[%c44] : memref<144xf32, #tpu.memory_space<smem>>
    %152 = vector.broadcast %151 : f32 to vector<8x16xf32>
    %153 = arith.mulf %152, %146 : vector<8x16xf32>
    %154 = arith.addf %137, %153 : vector<8x16xf32>
    %c80 = arith.constant 80 : index
    %155 = memref.load %arg3[%c80] : memref<144xf32, #tpu.memory_space<smem>>
    %156 = vector.broadcast %155 : f32 to vector<8x16xf32>
    %157 = arith.mulf %156, %146 : vector<8x16xf32>
    %158 = arith.addf %141, %157 : vector<8x16xf32>
    %c116 = arith.constant 116 : index
    %159 = memref.load %arg3[%c116] : memref<144xf32, #tpu.memory_space<smem>>
    %160 = vector.broadcast %159 : f32 to vector<8x16xf32>
    %161 = arith.mulf %160, %146 : vector<8x16xf32>
    %162 = arith.addf %145, %161 : vector<8x16xf32>
    %c0_9 = arith.constant 0 : index
    %c0_10 = arith.constant 0 : index
    %c1_11 = arith.constant 1 : index
    %c0_12 = arith.constant 0 : index
    %c0_13 = arith.constant 0 : index
    %163 = vector.load %arg2[%c0_9, %c0_10, %c1_11, %c0_12, %c0_13] : memref<1x1x4x10x18xf32, #tpu.memory_space<vmem>>, vector<1x1x1x10x18xf32>
    %164 = vector.shape_cast %163 : vector<1x1x1x10x18xf32> to vector<10x18xf32>
    %165 = vector.extract_strided_slice %164 {offsets = [0, 0], sizes = [8, 16], strides = [1, 1]} : vector<10x18xf32> to vector<8x16xf32>
    %c9 = arith.constant 9 : index
    %166 = memref.load %arg3[%c9] : memref<144xf32, #tpu.memory_space<smem>>
    %167 = vector.broadcast %166 : f32 to vector<8x16xf32>
    %168 = arith.mulf %167, %165 : vector<8x16xf32>
    %169 = arith.addf %150, %168 : vector<8x16xf32>
    %c45 = arith.constant 45 : index
    %170 = memref.load %arg3[%c45] : memref<144xf32, #tpu.memory_space<smem>>
    %171 = vector.broadcast %170 : f32 to vector<8x16xf32>
    %172 = arith.mulf %171, %165 : vector<8x16xf32>
    %173 = arith.addf %154, %172 : vector<8x16xf32>
    %c81 = arith.constant 81 : index
    %174 = memref.load %arg3[%c81] : memref<144xf32, #tpu.memory_space<smem>>
    %175 = vector.broadcast %174 : f32 to vector<8x16xf32>
    %176 = arith.mulf %175, %165 : vector<8x16xf32>
    %177 = arith.addf %158, %176 : vector<8x16xf32>
    %c117 = arith.constant 117 : index
    %178 = memref.load %arg3[%c117] : memref<144xf32, #tpu.memory_space<smem>>
    %179 = vector.broadcast %178 : f32 to vector<8x16xf32>
    %180 = arith.mulf %179, %165 : vector<8x16xf32>
    %181 = arith.addf %162, %180 : vector<8x16xf32>
    %182 = vector.extract_strided_slice %164 {offsets = [0, 1], sizes = [8, 16], strides = [1, 1]} : vector<10x18xf32> to vector<8x16xf32>
    %c10 = arith.constant 10 : index
    %183 = memref.load %arg3[%c10] : memref<144xf32, #tpu.memory_space<smem>>
    %184 = vector.broadcast %183 : f32 to vector<8x16xf32>
    %185 = arith.mulf %184, %182 : vector<8x16xf32>
    %186 = arith.addf %169, %185 : vector<8x16xf32>
    %c46 = arith.constant 46 : index
    %187 = memref.load %arg3[%c46] : memref<144xf32, #tpu.memory_space<smem>>
    %188 = vector.broadcast %187 : f32 to vector<8x16xf32>
    %189 = arith.mulf %188, %182 : vector<8x16xf32>
    %190 = arith.addf %173, %189 : vector<8x16xf32>
    %c82 = arith.constant 82 : index
    %191 = memref.load %arg3[%c82] : memref<144xf32, #tpu.memory_space<smem>>
    %192 = vector.broadcast %191 : f32 to vector<8x16xf32>
    %193 = arith.mulf %192, %182 : vector<8x16xf32>
    %194 = arith.addf %177, %193 : vector<8x16xf32>
    %c118 = arith.constant 118 : index
    %195 = memref.load %arg3[%c118] : memref<144xf32, #tpu.memory_space<smem>>
    %196 = vector.broadcast %195 : f32 to vector<8x16xf32>
    %197 = arith.mulf %196, %182 : vector<8x16xf32>
    %198 = arith.addf %181, %197 : vector<8x16xf32>
    %199 = vector.extract_strided_slice %164 {offsets = [0, 2], sizes = [8, 16], strides = [1, 1]} : vector<10x18xf32> to vector<8x16xf32>
    %c11 = arith.constant 11 : index
    %200 = memref.load %arg3[%c11] : memref<144xf32, #tpu.memory_space<smem>>
    %201 = vector.broadcast %200 : f32 to vector<8x16xf32>
    %202 = arith.mulf %201, %199 : vector<8x16xf32>
    %203 = arith.addf %186, %202 : vector<8x16xf32>
    %c47 = arith.constant 47 : index
    %204 = memref.load %arg3[%c47] : memref<144xf32, #tpu.memory_space<smem>>
    %205 = vector.broadcast %204 : f32 to vector<8x16xf32>
    %206 = arith.mulf %205, %199 : vector<8x16xf32>
    %207 = arith.addf %190, %206 : vector<8x16xf32>
    %c83 = arith.constant 83 : index
    %208 = memref.load %arg3[%c83] : memref<144xf32, #tpu.memory_space<smem>>
    %209 = vector.broadcast %208 : f32 to vector<8x16xf32>
    %210 = arith.mulf %209, %199 : vector<8x16xf32>
    %211 = arith.addf %194, %210 : vector<8x16xf32>
    %c119 = arith.constant 119 : index
    %212 = memref.load %arg3[%c119] : memref<144xf32, #tpu.memory_space<smem>>
    %213 = vector.broadcast %212 : f32 to vector<8x16xf32>
    %214 = arith.mulf %213, %199 : vector<8x16xf32>
    %215 = arith.addf %198, %214 : vector<8x16xf32>
    %216 = vector.extract_strided_slice %164 {offsets = [1, 0], sizes = [8, 16], strides = [1, 1]} : vector<10x18xf32> to vector<8x16xf32>
    %c12 = arith.constant 12 : index
    %217 = memref.load %arg3[%c12] : memref<144xf32, #tpu.memory_space<smem>>
    %218 = vector.broadcast %217 : f32 to vector<8x16xf32>
    %219 = arith.mulf %218, %216 : vector<8x16xf32>
    %220 = arith.addf %203, %219 : vector<8x16xf32>
    %c48 = arith.constant 48 : index
    %221 = memref.load %arg3[%c48] : memref<144xf32, #tpu.memory_space<smem>>
    %222 = vector.broadcast %221 : f32 to vector<8x16xf32>
    %223 = arith.mulf %222, %216 : vector<8x16xf32>
    %224 = arith.addf %207, %223 : vector<8x16xf32>
    %c84 = arith.constant 84 : index
    %225 = memref.load %arg3[%c84] : memref<144xf32, #tpu.memory_space<smem>>
    %226 = vector.broadcast %225 : f32 to vector<8x16xf32>
    %227 = arith.mulf %226, %216 : vector<8x16xf32>
    %228 = arith.addf %211, %227 : vector<8x16xf32>
    %c120 = arith.constant 120 : index
    %229 = memref.load %arg3[%c120] : memref<144xf32, #tpu.memory_space<smem>>
    %230 = vector.broadcast %229 : f32 to vector<8x16xf32>
    %231 = arith.mulf %230, %216 : vector<8x16xf32>
    %232 = arith.addf %215, %231 : vector<8x16xf32>
    %233 = vector.extract_strided_slice %164 {offsets = [1, 1], sizes = [8, 16], strides = [1, 1]} : vector<10x18xf32> to vector<8x16xf32>
    %c13 = arith.constant 13 : index
    %234 = memref.load %arg3[%c13] : memref<144xf32, #tpu.memory_space<smem>>
    %235 = vector.broadcast %234 : f32 to vector<8x16xf32>
    %236 = arith.mulf %235, %233 : vector<8x16xf32>
    %237 = arith.addf %220, %236 : vector<8x16xf32>
    %c49 = arith.constant 49 : index
    %238 = memref.load %arg3[%c49] : memref<144xf32, #tpu.memory_space<smem>>
    %239 = vector.broadcast %238 : f32 to vector<8x16xf32>
    %240 = arith.mulf %239, %233 : vector<8x16xf32>
    %241 = arith.addf %224, %240 : vector<8x16xf32>
    %c85 = arith.constant 85 : index
    %242 = memref.load %arg3[%c85] : memref<144xf32, #tpu.memory_space<smem>>
    %243 = vector.broadcast %242 : f32 to vector<8x16xf32>
    %244 = arith.mulf %243, %233 : vector<8x16xf32>
    %245 = arith.addf %228, %244 : vector<8x16xf32>
    %c121 = arith.constant 121 : index
    %246 = memref.load %arg3[%c121] : memref<144xf32, #tpu.memory_space<smem>>
    %247 = vector.broadcast %246 : f32 to vector<8x16xf32>
    %248 = arith.mulf %247, %233 : vector<8x16xf32>
    %249 = arith.addf %232, %248 : vector<8x16xf32>
    %250 = vector.extract_strided_slice %164 {offsets = [1, 2], sizes = [8, 16], strides = [1, 1]} : vector<10x18xf32> to vector<8x16xf32>
    %c14 = arith.constant 14 : index
    %251 = memref.load %arg3[%c14] : memref<144xf32, #tpu.memory_space<smem>>
    %252 = vector.broadcast %251 : f32 to vector<8x16xf32>
    %253 = arith.mulf %252, %250 : vector<8x16xf32>
    %254 = arith.addf %237, %253 : vector<8x16xf32>
    %c50 = arith.constant 50 : index
    %255 = memref.load %arg3[%c50] : memref<144xf32, #tpu.memory_space<smem>>
    %256 = vector.broadcast %255 : f32 to vector<8x16xf32>
    %257 = arith.mulf %256, %250 : vector<8x16xf32>
    %258 = arith.addf %241, %257 : vector<8x16xf32>
    %c86 = arith.constant 86 : index
    %259 = memref.load %arg3[%c86] : memref<144xf32, #tpu.memory_space<smem>>
    %260 = vector.broadcast %259 : f32 to vector<8x16xf32>
    %261 = arith.mulf %260, %250 : vector<8x16xf32>
    %262 = arith.addf %245, %261 : vector<8x16xf32>
    %c122 = arith.constant 122 : index
    %263 = memref.load %arg3[%c122] : memref<144xf32, #tpu.memory_space<smem>>
    %264 = vector.broadcast %263 : f32 to vector<8x16xf32>
    %265 = arith.mulf %264, %250 : vector<8x16xf32>
    %266 = arith.addf %249, %265 : vector<8x16xf32>
    %267 = vector.extract_strided_slice %164 {offsets = [2, 0], sizes = [8, 16], strides = [1, 1]} : vector<10x18xf32> to vector<8x16xf32>
    %c15 = arith.constant 15 : index
    %268 = memref.load %arg3[%c15] : memref<144xf32, #tpu.memory_space<smem>>
    %269 = vector.broadcast %268 : f32 to vector<8x16xf32>
    %270 = arith.mulf %269, %267 : vector<8x16xf32>
    %271 = arith.addf %254, %270 : vector<8x16xf32>
    %c51 = arith.constant 51 : index
    %272 = memref.load %arg3[%c51] : memref<144xf32, #tpu.memory_space<smem>>
    %273 = vector.broadcast %272 : f32 to vector<8x16xf32>
    %274 = arith.mulf %273, %267 : vector<8x16xf32>
    %275 = arith.addf %258, %274 : vector<8x16xf32>
    %c87 = arith.constant 87 : index
    %276 = memref.load %arg3[%c87] : memref<144xf32, #tpu.memory_space<smem>>
    %277 = vector.broadcast %276 : f32 to vector<8x16xf32>
    %278 = arith.mulf %277, %267 : vector<8x16xf32>
    %279 = arith.addf %262, %278 : vector<8x16xf32>
    %c123 = arith.constant 123 : index
    %280 = memref.load %arg3[%c123] : memref<144xf32, #tpu.memory_space<smem>>
    %281 = vector.broadcast %280 : f32 to vector<8x16xf32>
    %282 = arith.mulf %281, %267 : vector<8x16xf32>
    %283 = arith.addf %266, %282 : vector<8x16xf32>
    %284 = vector.extract_strided_slice %164 {offsets = [2, 1], sizes = [8, 16], strides = [1, 1]} : vector<10x18xf32> to vector<8x16xf32>
    %c16 = arith.constant 16 : index
    %285 = memref.load %arg3[%c16] : memref<144xf32, #tpu.memory_space<smem>>
    %286 = vector.broadcast %285 : f32 to vector<8x16xf32>
    %287 = arith.mulf %286, %284 : vector<8x16xf32>
    %288 = arith.addf %271, %287 : vector<8x16xf32>
    %c52 = arith.constant 52 : index
    %289 = memref.load %arg3[%c52] : memref<144xf32, #tpu.memory_space<smem>>
    %290 = vector.broadcast %289 : f32 to vector<8x16xf32>
    %291 = arith.mulf %290, %284 : vector<8x16xf32>
    %292 = arith.addf %275, %291 : vector<8x16xf32>
    %c88 = arith.constant 88 : index
    %293 = memref.load %arg3[%c88] : memref<144xf32, #tpu.memory_space<smem>>
    %294 = vector.broadcast %293 : f32 to vector<8x16xf32>
    %295 = arith.mulf %294, %284 : vector<8x16xf32>
    %296 = arith.addf %279, %295 : vector<8x16xf32>
    %c124 = arith.constant 124 : index
    %297 = memref.load %arg3[%c124] : memref<144xf32, #tpu.memory_space<smem>>
    %298 = vector.broadcast %297 : f32 to vector<8x16xf32>
    %299 = arith.mulf %298, %284 : vector<8x16xf32>
    %300 = arith.addf %283, %299 : vector<8x16xf32>
    %301 = vector.extract_strided_slice %164 {offsets = [2, 2], sizes = [8, 16], strides = [1, 1]} : vector<10x18xf32> to vector<8x16xf32>
    %c17 = arith.constant 17 : index
    %302 = memref.load %arg3[%c17] : memref<144xf32, #tpu.memory_space<smem>>
    %303 = vector.broadcast %302 : f32 to vector<8x16xf32>
    %304 = arith.mulf %303, %301 : vector<8x16xf32>
    %305 = arith.addf %288, %304 : vector<8x16xf32>
    %c53 = arith.constant 53 : index
    %306 = memref.load %arg3[%c53] : memref<144xf32, #tpu.memory_space<smem>>
    %307 = vector.broadcast %306 : f32 to vector<8x16xf32>
    %308 = arith.mulf %307, %301 : vector<8x16xf32>
    %309 = arith.addf %292, %308 : vector<8x16xf32>
    %c89 = arith.constant 89 : index
    %310 = memref.load %arg3[%c89] : memref<144xf32, #tpu.memory_space<smem>>
    %311 = vector.broadcast %310 : f32 to vector<8x16xf32>
    %312 = arith.mulf %311, %301 : vector<8x16xf32>
    %313 = arith.addf %296, %312 : vector<8x16xf32>
    %c125 = arith.constant 125 : index
    %314 = memref.load %arg3[%c125] : memref<144xf32, #tpu.memory_space<smem>>
    %315 = vector.broadcast %314 : f32 to vector<8x16xf32>
    %316 = arith.mulf %315, %301 : vector<8x16xf32>
    %317 = arith.addf %300, %316 : vector<8x16xf32>
    %c0_14 = arith.constant 0 : index
    %c0_15 = arith.constant 0 : index
    %c2_16 = arith.constant 2 : index
    %c0_17 = arith.constant 0 : index
    %c0_18 = arith.constant 0 : index
    %318 = vector.load %arg2[%c0_14, %c0_15, %c2_16, %c0_17, %c0_18] : memref<1x1x4x10x18xf32, #tpu.memory_space<vmem>>, vector<1x1x1x10x18xf32>
    %319 = vector.shape_cast %318 : vector<1x1x1x10x18xf32> to vector<10x18xf32>
    %320 = vector.extract_strided_slice %319 {offsets = [0, 0], sizes = [8, 16], strides = [1, 1]} : vector<10x18xf32> to vector<8x16xf32>
    %c18 = arith.constant 18 : index
    %321 = memref.load %arg3[%c18] : memref<144xf32, #tpu.memory_space<smem>>
    %322 = vector.broadcast %321 : f32 to vector<8x16xf32>
    %323 = arith.mulf %322, %320 : vector<8x16xf32>
    %324 = arith.addf %305, %323 : vector<8x16xf32>
    %c54 = arith.constant 54 : index
    %325 = memref.load %arg3[%c54] : memref<144xf32, #tpu.memory_space<smem>>
    %326 = vector.broadcast %325 : f32 to vector<8x16xf32>
    %327 = arith.mulf %326, %320 : vector<8x16xf32>
    %328 = arith.addf %309, %327 : vector<8x16xf32>
    %c90 = arith.constant 90 : index
    %329 = memref.load %arg3[%c90] : memref<144xf32, #tpu.memory_space<smem>>
    %330 = vector.broadcast %329 : f32 to vector<8x16xf32>
    %331 = arith.mulf %330, %320 : vector<8x16xf32>
    %332 = arith.addf %313, %331 : vector<8x16xf32>
    %c126 = arith.constant 126 : index
    %333 = memref.load %arg3[%c126] : memref<144xf32, #tpu.memory_space<smem>>
    %334 = vector.broadcast %333 : f32 to vector<8x16xf32>
    %335 = arith.mulf %334, %320 : vector<8x16xf32>
    %336 = arith.addf %317, %335 : vector<8x16xf32>
    %337 = vector.extract_strided_slice %319 {offsets = [0, 1], sizes = [8, 16], strides = [1, 1]} : vector<10x18xf32> to vector<8x16xf32>
    %c19 = arith.constant 19 : index
    %338 = memref.load %arg3[%c19] : memref<144xf32, #tpu.memory_space<smem>>
    %339 = vector.broadcast %338 : f32 to vector<8x16xf32>
    %340 = arith.mulf %339, %337 : vector<8x16xf32>
    %341 = arith.addf %324, %340 : vector<8x16xf32>
    %c55 = arith.constant 55 : index
    %342 = memref.load %arg3[%c55] : memref<144xf32, #tpu.memory_space<smem>>
    %343 = vector.broadcast %342 : f32 to vector<8x16xf32>
    %344 = arith.mulf %343, %337 : vector<8x16xf32>
    %345 = arith.addf %328, %344 : vector<8x16xf32>
    %c91 = arith.constant 91 : index
    %346 = memref.load %arg3[%c91] : memref<144xf32, #tpu.memory_space<smem>>
    %347 = vector.broadcast %346 : f32 to vector<8x16xf32>
    %348 = arith.mulf %347, %337 : vector<8x16xf32>
    %349 = arith.addf %332, %348 : vector<8x16xf32>
    %c127 = arith.constant 127 : index
    %350 = memref.load %arg3[%c127] : memref<144xf32, #tpu.memory_space<smem>>
    %351 = vector.broadcast %350 : f32 to vector<8x16xf32>
    %352 = arith.mulf %351, %337 : vector<8x16xf32>
    %353 = arith.addf %336, %352 : vector<8x16xf32>
    %354 = vector.extract_strided_slice %319 {offsets = [0, 2], sizes = [8, 16], strides = [1, 1]} : vector<10x18xf32> to vector<8x16xf32>
    %c20 = arith.constant 20 : index
    %355 = memref.load %arg3[%c20] : memref<144xf32, #tpu.memory_space<smem>>
    %356 = vector.broadcast %355 : f32 to vector<8x16xf32>
    %357 = arith.mulf %356, %354 : vector<8x16xf32>
    %358 = arith.addf %341, %357 : vector<8x16xf32>
    %c56 = arith.constant 56 : index
    %359 = memref.load %arg3[%c56] : memref<144xf32, #tpu.memory_space<smem>>
    %360 = vector.broadcast %359 : f32 to vector<8x16xf32>
    %361 = arith.mulf %360, %354 : vector<8x16xf32>
    %362 = arith.addf %345, %361 : vector<8x16xf32>
    %c92 = arith.constant 92 : index
    %363 = memref.load %arg3[%c92] : memref<144xf32, #tpu.memory_space<smem>>
    %364 = vector.broadcast %363 : f32 to vector<8x16xf32>
    %365 = arith.mulf %364, %354 : vector<8x16xf32>
    %366 = arith.addf %349, %365 : vector<8x16xf32>
    %c128 = arith.constant 128 : index
    %367 = memref.load %arg3[%c128] : memref<144xf32, #tpu.memory_space<smem>>
    %368 = vector.broadcast %367 : f32 to vector<8x16xf32>
    %369 = arith.mulf %368, %354 : vector<8x16xf32>
    %370 = arith.addf %353, %369 : vector<8x16xf32>
    %371 = vector.extract_strided_slice %319 {offsets = [1, 0], sizes = [8, 16], strides = [1, 1]} : vector<10x18xf32> to vector<8x16xf32>
    %c21 = arith.constant 21 : index
    %372 = memref.load %arg3[%c21] : memref<144xf32, #tpu.memory_space<smem>>
    %373 = vector.broadcast %372 : f32 to vector<8x16xf32>
    %374 = arith.mulf %373, %371 : vector<8x16xf32>
    %375 = arith.addf %358, %374 : vector<8x16xf32>
    %c57 = arith.constant 57 : index
    %376 = memref.load %arg3[%c57] : memref<144xf32, #tpu.memory_space<smem>>
    %377 = vector.broadcast %376 : f32 to vector<8x16xf32>
    %378 = arith.mulf %377, %371 : vector<8x16xf32>
    %379 = arith.addf %362, %378 : vector<8x16xf32>
    %c93 = arith.constant 93 : index
    %380 = memref.load %arg3[%c93] : memref<144xf32, #tpu.memory_space<smem>>
    %381 = vector.broadcast %380 : f32 to vector<8x16xf32>
    %382 = arith.mulf %381, %371 : vector<8x16xf32>
    %383 = arith.addf %366, %382 : vector<8x16xf32>
    %c129 = arith.constant 129 : index
    %384 = memref.load %arg3[%c129] : memref<144xf32, #tpu.memory_space<smem>>
    %385 = vector.broadcast %384 : f32 to vector<8x16xf32>
    %386 = arith.mulf %385, %371 : vector<8x16xf32>
    %387 = arith.addf %370, %386 : vector<8x16xf32>
    %388 = vector.extract_strided_slice %319 {offsets = [1, 1], sizes = [8, 16], strides = [1, 1]} : vector<10x18xf32> to vector<8x16xf32>
    %c22 = arith.constant 22 : index
    %389 = memref.load %arg3[%c22] : memref<144xf32, #tpu.memory_space<smem>>
    %390 = vector.broadcast %389 : f32 to vector<8x16xf32>
    %391 = arith.mulf %390, %388 : vector<8x16xf32>
    %392 = arith.addf %375, %391 : vector<8x16xf32>
    %c58 = arith.constant 58 : index
    %393 = memref.load %arg3[%c58] : memref<144xf32, #tpu.memory_space<smem>>
    %394 = vector.broadcast %393 : f32 to vector<8x16xf32>
    %395 = arith.mulf %394, %388 : vector<8x16xf32>
    %396 = arith.addf %379, %395 : vector<8x16xf32>
    %c94 = arith.constant 94 : index
    %397 = memref.load %arg3[%c94] : memref<144xf32, #tpu.memory_space<smem>>
    %398 = vector.broadcast %397 : f32 to vector<8x16xf32>
    %399 = arith.mulf %398, %388 : vector<8x16xf32>
    %400 = arith.addf %383, %399 : vector<8x16xf32>
    %c130 = arith.constant 130 : index
    %401 = memref.load %arg3[%c130] : memref<144xf32, #tpu.memory_space<smem>>
    %402 = vector.broadcast %401 : f32 to vector<8x16xf32>
    %403 = arith.mulf %402, %388 : vector<8x16xf32>
    %404 = arith.addf %387, %403 : vector<8x16xf32>
    %405 = vector.extract_strided_slice %319 {offsets = [1, 2], sizes = [8, 16], strides = [1, 1]} : vector<10x18xf32> to vector<8x16xf32>
    %c23 = arith.constant 23 : index
    %406 = memref.load %arg3[%c23] : memref<144xf32, #tpu.memory_space<smem>>
    %407 = vector.broadcast %406 : f32 to vector<8x16xf32>
    %408 = arith.mulf %407, %405 : vector<8x16xf32>
    %409 = arith.addf %392, %408 : vector<8x16xf32>
    %c59 = arith.constant 59 : index
    %410 = memref.load %arg3[%c59] : memref<144xf32, #tpu.memory_space<smem>>
    %411 = vector.broadcast %410 : f32 to vector<8x16xf32>
    %412 = arith.mulf %411, %405 : vector<8x16xf32>
    %413 = arith.addf %396, %412 : vector<8x16xf32>
    %c95 = arith.constant 95 : index
    %414 = memref.load %arg3[%c95] : memref<144xf32, #tpu.memory_space<smem>>
    %415 = vector.broadcast %414 : f32 to vector<8x16xf32>
    %416 = arith.mulf %415, %405 : vector<8x16xf32>
    %417 = arith.addf %400, %416 : vector<8x16xf32>
    %c131 = arith.constant 131 : index
    %418 = memref.load %arg3[%c131] : memref<144xf32, #tpu.memory_space<smem>>
    %419 = vector.broadcast %418 : f32 to vector<8x16xf32>
    %420 = arith.mulf %419, %405 : vector<8x16xf32>
    %421 = arith.addf %404, %420 : vector<8x16xf32>
    %422 = vector.extract_strided_slice %319 {offsets = [2, 0], sizes = [8, 16], strides = [1, 1]} : vector<10x18xf32> to vector<8x16xf32>
    %c24 = arith.constant 24 : index
    %423 = memref.load %arg3[%c24] : memref<144xf32, #tpu.memory_space<smem>>
    %424 = vector.broadcast %423 : f32 to vector<8x16xf32>
    %425 = arith.mulf %424, %422 : vector<8x16xf32>
    %426 = arith.addf %409, %425 : vector<8x16xf32>
    %c60 = arith.constant 60 : index
    %427 = memref.load %arg3[%c60] : memref<144xf32, #tpu.memory_space<smem>>
    %428 = vector.broadcast %427 : f32 to vector<8x16xf32>
    %429 = arith.mulf %428, %422 : vector<8x16xf32>
    %430 = arith.addf %413, %429 : vector<8x16xf32>
    %c96 = arith.constant 96 : index
    %431 = memref.load %arg3[%c96] : memref<144xf32, #tpu.memory_space<smem>>
    %432 = vector.broadcast %431 : f32 to vector<8x16xf32>
    %433 = arith.mulf %432, %422 : vector<8x16xf32>
    %434 = arith.addf %417, %433 : vector<8x16xf32>
    %c132 = arith.constant 132 : index
    %435 = memref.load %arg3[%c132] : memref<144xf32, #tpu.memory_space<smem>>
    %436 = vector.broadcast %435 : f32 to vector<8x16xf32>
    %437 = arith.mulf %436, %422 : vector<8x16xf32>
    %438 = arith.addf %421, %437 : vector<8x16xf32>
    %439 = vector.extract_strided_slice %319 {offsets = [2, 1], sizes = [8, 16], strides = [1, 1]} : vector<10x18xf32> to vector<8x16xf32>
    %c25 = arith.constant 25 : index
    %440 = memref.load %arg3[%c25] : memref<144xf32, #tpu.memory_space<smem>>
    %441 = vector.broadcast %440 : f32 to vector<8x16xf32>
    %442 = arith.mulf %441, %439 : vector<8x16xf32>
    %443 = arith.addf %426, %442 : vector<8x16xf32>
    %c61 = arith.constant 61 : index
    %444 = memref.load %arg3[%c61] : memref<144xf32, #tpu.memory_space<smem>>
    %445 = vector.broadcast %444 : f32 to vector<8x16xf32>
    %446 = arith.mulf %445, %439 : vector<8x16xf32>
    %447 = arith.addf %430, %446 : vector<8x16xf32>
    %c97 = arith.constant 97 : index
    %448 = memref.load %arg3[%c97] : memref<144xf32, #tpu.memory_space<smem>>
    %449 = vector.broadcast %448 : f32 to vector<8x16xf32>
    %450 = arith.mulf %449, %439 : vector<8x16xf32>
    %451 = arith.addf %434, %450 : vector<8x16xf32>
    %c133 = arith.constant 133 : index
    %452 = memref.load %arg3[%c133] : memref<144xf32, #tpu.memory_space<smem>>
    %453 = vector.broadcast %452 : f32 to vector<8x16xf32>
    %454 = arith.mulf %453, %439 : vector<8x16xf32>
    %455 = arith.addf %438, %454 : vector<8x16xf32>
    %456 = vector.extract_strided_slice %319 {offsets = [2, 2], sizes = [8, 16], strides = [1, 1]} : vector<10x18xf32> to vector<8x16xf32>
    %c26 = arith.constant 26 : index
    %457 = memref.load %arg3[%c26] : memref<144xf32, #tpu.memory_space<smem>>
    %458 = vector.broadcast %457 : f32 to vector<8x16xf32>
    %459 = arith.mulf %458, %456 : vector<8x16xf32>
    %460 = arith.addf %443, %459 : vector<8x16xf32>
    %c62 = arith.constant 62 : index
    %461 = memref.load %arg3[%c62] : memref<144xf32, #tpu.memory_space<smem>>
    %462 = vector.broadcast %461 : f32 to vector<8x16xf32>
    %463 = arith.mulf %462, %456 : vector<8x16xf32>
    %464 = arith.addf %447, %463 : vector<8x16xf32>
    %c98 = arith.constant 98 : index
    %465 = memref.load %arg3[%c98] : memref<144xf32, #tpu.memory_space<smem>>
    %466 = vector.broadcast %465 : f32 to vector<8x16xf32>
    %467 = arith.mulf %466, %456 : vector<8x16xf32>
    %468 = arith.addf %451, %467 : vector<8x16xf32>
    %c134 = arith.constant 134 : index
    %469 = memref.load %arg3[%c134] : memref<144xf32, #tpu.memory_space<smem>>
    %470 = vector.broadcast %469 : f32 to vector<8x16xf32>
    %471 = arith.mulf %470, %456 : vector<8x16xf32>
    %472 = arith.addf %455, %471 : vector<8x16xf32>
    %c0_19 = arith.constant 0 : index
    %c0_20 = arith.constant 0 : index
    %c3_21 = arith.constant 3 : index
    %c0_22 = arith.constant 0 : index
    %c0_23 = arith.constant 0 : index
    %473 = vector.load %arg2[%c0_19, %c0_20, %c3_21, %c0_22, %c0_23] : memref<1x1x4x10x18xf32, #tpu.memory_space<vmem>>, vector<1x1x1x10x18xf32>
    %474 = vector.shape_cast %473 : vector<1x1x1x10x18xf32> to vector<10x18xf32>
    %475 = vector.extract_strided_slice %474 {offsets = [0, 0], sizes = [8, 16], strides = [1, 1]} : vector<10x18xf32> to vector<8x16xf32>
    %c27 = arith.constant 27 : index
    %476 = memref.load %arg3[%c27] : memref<144xf32, #tpu.memory_space<smem>>
    %477 = vector.broadcast %476 : f32 to vector<8x16xf32>
    %478 = arith.mulf %477, %475 : vector<8x16xf32>
    %479 = arith.addf %460, %478 : vector<8x16xf32>
    %c63 = arith.constant 63 : index
    %480 = memref.load %arg3[%c63] : memref<144xf32, #tpu.memory_space<smem>>
    %481 = vector.broadcast %480 : f32 to vector<8x16xf32>
    %482 = arith.mulf %481, %475 : vector<8x16xf32>
    %483 = arith.addf %464, %482 : vector<8x16xf32>
    %c99 = arith.constant 99 : index
    %484 = memref.load %arg3[%c99] : memref<144xf32, #tpu.memory_space<smem>>
    %485 = vector.broadcast %484 : f32 to vector<8x16xf32>
    %486 = arith.mulf %485, %475 : vector<8x16xf32>
    %487 = arith.addf %468, %486 : vector<8x16xf32>
    %c135 = arith.constant 135 : index
    %488 = memref.load %arg3[%c135] : memref<144xf32, #tpu.memory_space<smem>>
    %489 = vector.broadcast %488 : f32 to vector<8x16xf32>
    %490 = arith.mulf %489, %475 : vector<8x16xf32>
    %491 = arith.addf %472, %490 : vector<8x16xf32>
    %492 = vector.extract_strided_slice %474 {offsets = [0, 1], sizes = [8, 16], strides = [1, 1]} : vector<10x18xf32> to vector<8x16xf32>
    %c28 = arith.constant 28 : index
    %493 = memref.load %arg3[%c28] : memref<144xf32, #tpu.memory_space<smem>>
    %494 = vector.broadcast %493 : f32 to vector<8x16xf32>
    %495 = arith.mulf %494, %492 : vector<8x16xf32>
    %496 = arith.addf %479, %495 : vector<8x16xf32>
    %c64 = arith.constant 64 : index
    %497 = memref.load %arg3[%c64] : memref<144xf32, #tpu.memory_space<smem>>
    %498 = vector.broadcast %497 : f32 to vector<8x16xf32>
    %499 = arith.mulf %498, %492 : vector<8x16xf32>
    %500 = arith.addf %483, %499 : vector<8x16xf32>
    %c100 = arith.constant 100 : index
    %501 = memref.load %arg3[%c100] : memref<144xf32, #tpu.memory_space<smem>>
    %502 = vector.broadcast %501 : f32 to vector<8x16xf32>
    %503 = arith.mulf %502, %492 : vector<8x16xf32>
    %504 = arith.addf %487, %503 : vector<8x16xf32>
    %c136 = arith.constant 136 : index
    %505 = memref.load %arg3[%c136] : memref<144xf32, #tpu.memory_space<smem>>
    %506 = vector.broadcast %505 : f32 to vector<8x16xf32>
    %507 = arith.mulf %506, %492 : vector<8x16xf32>
    %508 = arith.addf %491, %507 : vector<8x16xf32>
    %509 = vector.extract_strided_slice %474 {offsets = [0, 2], sizes = [8, 16], strides = [1, 1]} : vector<10x18xf32> to vector<8x16xf32>
    %c29 = arith.constant 29 : index
    %510 = memref.load %arg3[%c29] : memref<144xf32, #tpu.memory_space<smem>>
    %511 = vector.broadcast %510 : f32 to vector<8x16xf32>
    %512 = arith.mulf %511, %509 : vector<8x16xf32>
    %513 = arith.addf %496, %512 : vector<8x16xf32>
    %c65 = arith.constant 65 : index
    %514 = memref.load %arg3[%c65] : memref<144xf32, #tpu.memory_space<smem>>
    %515 = vector.broadcast %514 : f32 to vector<8x16xf32>
    %516 = arith.mulf %515, %509 : vector<8x16xf32>
    %517 = arith.addf %500, %516 : vector<8x16xf32>
    %c101 = arith.constant 101 : index
    %518 = memref.load %arg3[%c101] : memref<144xf32, #tpu.memory_space<smem>>
    %519 = vector.broadcast %518 : f32 to vector<8x16xf32>
    %520 = arith.mulf %519, %509 : vector<8x16xf32>
    %521 = arith.addf %504, %520 : vector<8x16xf32>
    %c137 = arith.constant 137 : index
    %522 = memref.load %arg3[%c137] : memref<144xf32, #tpu.memory_space<smem>>
    %523 = vector.broadcast %522 : f32 to vector<8x16xf32>
    %524 = arith.mulf %523, %509 : vector<8x16xf32>
    %525 = arith.addf %508, %524 : vector<8x16xf32>
    %526 = vector.extract_strided_slice %474 {offsets = [1, 0], sizes = [8, 16], strides = [1, 1]} : vector<10x18xf32> to vector<8x16xf32>
    %c30 = arith.constant 30 : index
    %527 = memref.load %arg3[%c30] : memref<144xf32, #tpu.memory_space<smem>>
    %528 = vector.broadcast %527 : f32 to vector<8x16xf32>
    %529 = arith.mulf %528, %526 : vector<8x16xf32>
    %530 = arith.addf %513, %529 : vector<8x16xf32>
    %c66 = arith.constant 66 : index
    %531 = memref.load %arg3[%c66] : memref<144xf32, #tpu.memory_space<smem>>
    %532 = vector.broadcast %531 : f32 to vector<8x16xf32>
    %533 = arith.mulf %532, %526 : vector<8x16xf32>
    %534 = arith.addf %517, %533 : vector<8x16xf32>
    %c102 = arith.constant 102 : index
    %535 = memref.load %arg3[%c102] : memref<144xf32, #tpu.memory_space<smem>>
    %536 = vector.broadcast %535 : f32 to vector<8x16xf32>
    %537 = arith.mulf %536, %526 : vector<8x16xf32>
    %538 = arith.addf %521, %537 : vector<8x16xf32>
    %c138 = arith.constant 138 : index
    %539 = memref.load %arg3[%c138] : memref<144xf32, #tpu.memory_space<smem>>
    %540 = vector.broadcast %539 : f32 to vector<8x16xf32>
    %541 = arith.mulf %540, %526 : vector<8x16xf32>
    %542 = arith.addf %525, %541 : vector<8x16xf32>
    %543 = vector.extract_strided_slice %474 {offsets = [1, 1], sizes = [8, 16], strides = [1, 1]} : vector<10x18xf32> to vector<8x16xf32>
    %c31 = arith.constant 31 : index
    %544 = memref.load %arg3[%c31] : memref<144xf32, #tpu.memory_space<smem>>
    %545 = vector.broadcast %544 : f32 to vector<8x16xf32>
    %546 = arith.mulf %545, %543 : vector<8x16xf32>
    %547 = arith.addf %530, %546 : vector<8x16xf32>
    %c67 = arith.constant 67 : index
    %548 = memref.load %arg3[%c67] : memref<144xf32, #tpu.memory_space<smem>>
    %549 = vector.broadcast %548 : f32 to vector<8x16xf32>
    %550 = arith.mulf %549, %543 : vector<8x16xf32>
    %551 = arith.addf %534, %550 : vector<8x16xf32>
    %c103 = arith.constant 103 : index
    %552 = memref.load %arg3[%c103] : memref<144xf32, #tpu.memory_space<smem>>
    %553 = vector.broadcast %552 : f32 to vector<8x16xf32>
    %554 = arith.mulf %553, %543 : vector<8x16xf32>
    %555 = arith.addf %538, %554 : vector<8x16xf32>
    %c139 = arith.constant 139 : index
    %556 = memref.load %arg3[%c139] : memref<144xf32, #tpu.memory_space<smem>>
    %557 = vector.broadcast %556 : f32 to vector<8x16xf32>
    %558 = arith.mulf %557, %543 : vector<8x16xf32>
    %559 = arith.addf %542, %558 : vector<8x16xf32>
    %560 = vector.extract_strided_slice %474 {offsets = [1, 2], sizes = [8, 16], strides = [1, 1]} : vector<10x18xf32> to vector<8x16xf32>
    %c32 = arith.constant 32 : index
    %561 = memref.load %arg3[%c32] : memref<144xf32, #tpu.memory_space<smem>>
    %562 = vector.broadcast %561 : f32 to vector<8x16xf32>
    %563 = arith.mulf %562, %560 : vector<8x16xf32>
    %564 = arith.addf %547, %563 : vector<8x16xf32>
    %c68 = arith.constant 68 : index
    %565 = memref.load %arg3[%c68] : memref<144xf32, #tpu.memory_space<smem>>
    %566 = vector.broadcast %565 : f32 to vector<8x16xf32>
    %567 = arith.mulf %566, %560 : vector<8x16xf32>
    %568 = arith.addf %551, %567 : vector<8x16xf32>
    %c104 = arith.constant 104 : index
    %569 = memref.load %arg3[%c104] : memref<144xf32, #tpu.memory_space<smem>>
    %570 = vector.broadcast %569 : f32 to vector<8x16xf32>
    %571 = arith.mulf %570, %560 : vector<8x16xf32>
    %572 = arith.addf %555, %571 : vector<8x16xf32>
    %c140 = arith.constant 140 : index
    %573 = memref.load %arg3[%c140] : memref<144xf32, #tpu.memory_space<smem>>
    %574 = vector.broadcast %573 : f32 to vector<8x16xf32>
    %575 = arith.mulf %574, %560 : vector<8x16xf32>
    %576 = arith.addf %559, %575 : vector<8x16xf32>
    %577 = vector.extract_strided_slice %474 {offsets = [2, 0], sizes = [8, 16], strides = [1, 1]} : vector<10x18xf32> to vector<8x16xf32>
    %c33 = arith.constant 33 : index
    %578 = memref.load %arg3[%c33] : memref<144xf32, #tpu.memory_space<smem>>
    %579 = vector.broadcast %578 : f32 to vector<8x16xf32>
    %580 = arith.mulf %579, %577 : vector<8x16xf32>
    %581 = arith.addf %564, %580 : vector<8x16xf32>
    %c69 = arith.constant 69 : index
    %582 = memref.load %arg3[%c69] : memref<144xf32, #tpu.memory_space<smem>>
    %583 = vector.broadcast %582 : f32 to vector<8x16xf32>
    %584 = arith.mulf %583, %577 : vector<8x16xf32>
    %585 = arith.addf %568, %584 : vector<8x16xf32>
    %c105 = arith.constant 105 : index
    %586 = memref.load %arg3[%c105] : memref<144xf32, #tpu.memory_space<smem>>
    %587 = vector.broadcast %586 : f32 to vector<8x16xf32>
    %588 = arith.mulf %587, %577 : vector<8x16xf32>
    %589 = arith.addf %572, %588 : vector<8x16xf32>
    %c141 = arith.constant 141 : index
    %590 = memref.load %arg3[%c141] : memref<144xf32, #tpu.memory_space<smem>>
    %591 = vector.broadcast %590 : f32 to vector<8x16xf32>
    %592 = arith.mulf %591, %577 : vector<8x16xf32>
    %593 = arith.addf %576, %592 : vector<8x16xf32>
    %594 = vector.extract_strided_slice %474 {offsets = [2, 1], sizes = [8, 16], strides = [1, 1]} : vector<10x18xf32> to vector<8x16xf32>
    %c34 = arith.constant 34 : index
    %595 = memref.load %arg3[%c34] : memref<144xf32, #tpu.memory_space<smem>>
    %596 = vector.broadcast %595 : f32 to vector<8x16xf32>
    %597 = arith.mulf %596, %594 : vector<8x16xf32>
    %598 = arith.addf %581, %597 : vector<8x16xf32>
    %c70 = arith.constant 70 : index
    %599 = memref.load %arg3[%c70] : memref<144xf32, #tpu.memory_space<smem>>
    %600 = vector.broadcast %599 : f32 to vector<8x16xf32>
    %601 = arith.mulf %600, %594 : vector<8x16xf32>
    %602 = arith.addf %585, %601 : vector<8x16xf32>
    %c106 = arith.constant 106 : index
    %603 = memref.load %arg3[%c106] : memref<144xf32, #tpu.memory_space<smem>>
    %604 = vector.broadcast %603 : f32 to vector<8x16xf32>
    %605 = arith.mulf %604, %594 : vector<8x16xf32>
    %606 = arith.addf %589, %605 : vector<8x16xf32>
    %c142 = arith.constant 142 : index
    %607 = memref.load %arg3[%c142] : memref<144xf32, #tpu.memory_space<smem>>
    %608 = vector.broadcast %607 : f32 to vector<8x16xf32>
    %609 = arith.mulf %608, %594 : vector<8x16xf32>
    %610 = arith.addf %593, %609 : vector<8x16xf32>
    %611 = vector.extract_strided_slice %474 {offsets = [2, 2], sizes = [8, 16], strides = [1, 1]} : vector<10x18xf32> to vector<8x16xf32>
    %c35 = arith.constant 35 : index
    %612 = memref.load %arg3[%c35] : memref<144xf32, #tpu.memory_space<smem>>
    %613 = vector.broadcast %612 : f32 to vector<8x16xf32>
    %614 = arith.mulf %613, %611 : vector<8x16xf32>
    %615 = arith.addf %598, %614 : vector<8x16xf32>
    %c71 = arith.constant 71 : index
    %616 = memref.load %arg3[%c71] : memref<144xf32, #tpu.memory_space<smem>>
    %617 = vector.broadcast %616 : f32 to vector<8x16xf32>
    %618 = arith.mulf %617, %611 : vector<8x16xf32>
    %619 = arith.addf %602, %618 : vector<8x16xf32>
    %c107 = arith.constant 107 : index
    %620 = memref.load %arg3[%c107] : memref<144xf32, #tpu.memory_space<smem>>
    %621 = vector.broadcast %620 : f32 to vector<8x16xf32>
    %622 = arith.mulf %621, %611 : vector<8x16xf32>
    %623 = arith.addf %606, %622 : vector<8x16xf32>
    %c143 = arith.constant 143 : index
    %624 = memref.load %arg3[%c143] : memref<144xf32, #tpu.memory_space<smem>>
    %625 = vector.broadcast %624 : f32 to vector<8x16xf32>
    %626 = arith.mulf %625, %611 : vector<8x16xf32>
    %627 = arith.addf %610, %626 : vector<8x16xf32>
    %cst = arith.constant 0.000000e+00 : f32
    %628 = vector.broadcast %cst : f32 to vector<8x16xf32>
    %629 = arith.cmpf oge, %615, %628 : vector<8x16xf32>
    %cst_24 = arith.constant 0.00999999977 : f32
    %630 = vector.broadcast %cst_24 : f32 to vector<8x16xf32>
    %631 = arith.mulf %630, %615 : vector<8x16xf32>
    %632 = arith.select %629, %615, %631 : vector<8x16xi1>, vector<8x16xf32>
    %c0_25 = arith.constant 0 : index
    %c0_26 = arith.constant 0 : index
    %c0_27 = arith.constant 0 : index
    %c1_28 = arith.constant 1 : index
    %c1_29 = arith.constant 1 : index
    %633 = vector.load %arg2[%c0_25, %c0_26, %c0_27, %c1_28, %c1_29] : memref<1x1x4x10x18xf32, #tpu.memory_space<vmem>>, vector<1x1x1x8x16xf32>
    %634 = vector.shape_cast %633 : vector<1x1x1x8x16xf32> to vector<8x16xf32>
    %635 = arith.addf %632, %634 : vector<8x16xf32>
    %c0_30 = arith.constant 0 : index
    %c0_31 = arith.constant 0 : index
    %c0_32 = arith.constant 0 : index
    %c0_33 = arith.constant 0 : index
    %636 = vector.load %arg5[%c0_30, %c0_31, %c0_32, %c0_33] : memref<1x4x8x16xf32, #tpu.memory_space<vmem>>, vector<1x1x8x16xf32>
    %637 = vector.shape_cast %636 : vector<1x1x8x16xf32> to vector<8x16xf32>
    %638 = vector.shape_cast %635 : vector<8x16xf32> to vector<1x1x8x16xf32>
    tpu.vector_store %arg5[%c0_30, %c0_31, %c0_32, %c0_33], %638 {strides = array<i32>} : memref<1x4x8x16xf32, #tpu.memory_space<vmem>>, vector<1x1x8x16xf32>,
    %cst_34 = arith.constant 0.000000e+00 : f32
    %639 = vector.broadcast %cst_34 : f32 to vector<8x16xf32>
    %640 = arith.cmpf oge, %619, %639 : vector<8x16xf32>
    %cst_35 = arith.constant 0.00999999977 : f32
    %641 = vector.broadcast %cst_35 : f32 to vector<8x16xf32>
    %642 = arith.mulf %641, %619 : vector<8x16xf32>
    %643 = arith.select %640, %619, %642 : vector<8x16xi1>, vector<8x16xf32>
    %c0_36 = arith.constant 0 : index
    %c0_37 = arith.constant 0 : index
    %c1_38 = arith.constant 1 : index
    %c1_39 = arith.constant 1 : index
    %c1_40 = arith.constant 1 : index
    %644 = vector.load %arg2[%c0_36, %c0_37, %c1_38, %c1_39, %c1_40] : memref<1x1x4x10x18xf32, #tpu.memory_space<vmem>>, vector<1x1x1x8x16xf32>
    %645 = vector.shape_cast %644 : vector<1x1x1x8x16xf32> to vector<8x16xf32>
    %646 = arith.addf %643, %645 : vector<8x16xf32>
    %c0_41 = arith.constant 0 : index
    %c1_42 = arith.constant 1 : index
    %c0_43 = arith.constant 0 : index
    %c0_44 = arith.constant 0 : index
    %647 = vector.load %arg5[%c0_41, %c1_42, %c0_43, %c0_44] : memref<1x4x8x16xf32, #tpu.memory_space<vmem>>, vector<1x1x8x16xf32>
    %648 = vector.shape_cast %647 : vector<1x1x8x16xf32> to vector<8x16xf32>
    %649 = vector.shape_cast %646 : vector<8x16xf32> to vector<1x1x8x16xf32>
    tpu.vector_store %arg5[%c0_41, %c1_42, %c0_43, %c0_44], %649 {strides = array<i32>} : memref<1x4x8x16xf32, #tpu.memory_space<vmem>>, vector<1x1x8x16xf32>,
    %cst_45 = arith.constant 0.000000e+00 : f32
    %650 = vector.broadcast %cst_45 : f32 to vector<8x16xf32>
    %651 = arith.cmpf oge, %623, %650 : vector<8x16xf32>
    %cst_46 = arith.constant 0.00999999977 : f32
    %652 = vector.broadcast %cst_46 : f32 to vector<8x16xf32>
    %653 = arith.mulf %652, %623 : vector<8x16xf32>
    %654 = arith.select %651, %623, %653 : vector<8x16xi1>, vector<8x16xf32>
    %c0_47 = arith.constant 0 : index
    %c0_48 = arith.constant 0 : index
    %c2_49 = arith.constant 2 : index
    %c1_50 = arith.constant 1 : index
    %c1_51 = arith.constant 1 : index
    %655 = vector.load %arg2[%c0_47, %c0_48, %c2_49, %c1_50, %c1_51] : memref<1x1x4x10x18xf32, #tpu.memory_space<vmem>>, vector<1x1x1x8x16xf32>
    %656 = vector.shape_cast %655 : vector<1x1x1x8x16xf32> to vector<8x16xf32>
    %657 = arith.addf %654, %656 : vector<8x16xf32>
    %c0_52 = arith.constant 0 : index
    %c2_53 = arith.constant 2 : index
    %c0_54 = arith.constant 0 : index
    %c0_55 = arith.constant 0 : index
    %658 = vector.load %arg5[%c0_52, %c2_53, %c0_54, %c0_55] : memref<1x4x8x16xf32, #tpu.memory_space<vmem>>, vector<1x1x8x16xf32>
    %659 = vector.shape_cast %658 : vector<1x1x8x16xf32> to vector<8x16xf32>
    %660 = vector.shape_cast %657 : vector<8x16xf32> to vector<1x1x8x16xf32>
    tpu.vector_store %arg5[%c0_52, %c2_53, %c0_54, %c0_55], %660 {strides = array<i32>} : memref<1x4x8x16xf32, #tpu.memory_space<vmem>>, vector<1x1x8x16xf32>,
    %cst_56 = arith.constant 0.000000e+00 : f32
    %661 = vector.broadcast %cst_56 : f32 to vector<8x16xf32>
    %662 = arith.cmpf oge, %627, %661 : vector<8x16xf32>
    %cst_57 = arith.constant 0.00999999977 : f32
    %663 = vector.broadcast %cst_57 : f32 to vector<8x16xf32>
    %664 = arith.mulf %663, %627 : vector<8x16xf32>
    %665 = arith.select %662, %627, %664 : vector<8x16xi1>, vector<8x16xf32>
    %c0_58 = arith.constant 0 : index
    %c0_59 = arith.constant 0 : index
    %c3_60 = arith.constant 3 : index
    %c1_61 = arith.constant 1 : index
    %c1_62 = arith.constant 1 : index
    %666 = vector.load %arg2[%c0_58, %c0_59, %c3_60, %c1_61, %c1_62] : memref<1x1x4x10x18xf32, #tpu.memory_space<vmem>>, vector<1x1x1x8x16xf32>
    %667 = vector.shape_cast %666 : vector<1x1x1x8x16xf32> to vector<8x16xf32>
    %668 = arith.addf %665, %667 : vector<8x16xf32>
    %c0_63 = arith.constant 0 : index
    %c3_64 = arith.constant 3 : index
    %c0_65 = arith.constant 0 : index
    %c0_66 = arith.constant 0 : index
    %669 = vector.load %arg5[%c0_63, %c3_64, %c0_65, %c0_66] : memref<1x4x8x16xf32, #tpu.memory_space<vmem>>, vector<1x1x8x16xf32>
    %670 = vector.shape_cast %669 : vector<1x1x8x16xf32> to vector<8x16xf32>
    %671 = vector.shape_cast %668 : vector<8x16xf32> to vector<1x1x8x16xf32>
    tpu.vector_store %arg5[%c0_63, %c3_64, %c0_65, %c0_66], %671 {strides = array<i32>} : memref<1x4x8x16xf32, #tpu.memory_space<vmem>>, vector<1x1x8x16xf32>,
    return
  }
  func.func @transform_0(%arg0: i32, %arg1: i32) -> (i32, i32, i32, i32, i32) {
    %c0_i32 = arith.constant 0 : i32
    %c0_i32_0 = arith.constant 0 : i32
    %c0_i32_1 = arith.constant 0 : i32
    %c0_i32_2 = arith.constant 0 : i32
    return %arg0, %arg1, %c0_i32, %c0_i32_0, %c0_i32_1 : i32, i32, i32, i32, i32
  }
  func.func @transform_1(%arg0: i32, %arg1: i32) -> i32 {
    %c0_i32 = arith.constant 0 : i32
    %c0_i32_0 = arith.constant 0 : i32
    return %c0_i32 : i32
  }
  func.func @transform_2(%arg0: i32, %arg1: i32) -> i32 {
    %c0_i32 = arith.constant 0 : i32
    %c0_i32_0 = arith.constant 0 : i32
    return %c0_i32 : i32
  }
  func.func @transform_3(%arg0: i32, %arg1: i32) -> (i32, i32, i32, i32) {
    %c0_i32 = arith.constant 0 : i32
    %c0_i32_0 = arith.constant 0 : i32
    %c0_i32_1 = arith.constant 0 : i32
    return %arg0, %c0_i32, %arg1, %c0_i32_0 : i32, i32, i32, i32
  }
}

</mosaic_0001>

<bundles_post_ra>
// kernel: conv_block2.1
= control target key start
LH: loop header
LB: loop body
LE: loop exit
PB: predicated region body
PF: predicated region fallthrough
CT: control target
= control target key end

     0   :  { %s3593_s0 = inlined_call_operand.vmem [shape: f32[2,2,4,10,18], index: 0, kind: input, shape index: {}]   ;;  %s3594_s1 = inlined_call_operand.vmem [shape: f32[144], index: 1, kind: input, shape index: {}]   ;;  %s3595_s2 = inlined_call_operand.vmem [shape: f32[4], index: 2, kind: input, shape index: {}]   ;;  %s3596_s3 = inlined_call_operand.hbm [shape: f32[2,4,16,16], index: 3, kind: output, shape index: {}]  }
   0x1   :  { %3604 = sst [smem:[#allocation12_spill]] %s3593_s0 }
   0x2   :  { %3605 = sst [smem:[#allocation13_spill]] %s3594_s1 }
   0x3   :  { %3606 = sst [smem:[#allocation14_spill]] %s3595_s2 }
   0x4   :  { %8 = vsyncpa [#allocation4], 0 }
   0x5   :  { %9 = vsyncpa [#allocation6], 0 }
   0x6   :  { %10 = vsyncpa [#allocation3], 0 }
   0x7   :  { %12 = vsyncpa [#allocation3 + $0x1], 0  ;;  %s2357_s12 = smov 0   ;;  %s2359_s13 = smov 0  }
   0x8   :  { %s2361_s14 = smov 0   ;;  %s2363_s15 = smov 0  }
   0x9   :  { %s2365_s16 = smov 0   ;;  %s2367_s17 = smov 0  }
   0xa   :  { %s2369_s18 = smov 0   ;;  %s2371_s19 = smov 0  }
   0xb LB: > { %s1914_s20 = sadd.s32 4294967295, %s2327_s19   ;;  %s1915_s21 = sadd.s32 4294967294, %s2327_s19   ;;  %s2327_s19 = sphi %s2371_s19, %s18_s19   ;;  %s2323_s18 = sphi %s2369_s18, %s3628_s18   ;;  %s2319_s17 = sphi %s2367_s17, %s3627_s17   ;;  %s2315_s16 = sphi %s2365_s16, %s3626_s16   ;;  %s2311_s15 = sphi %s2363_s15, %s3625_s15   ;;  %s2307_s14 = sphi %s2361_s14, %s3624_s14   ;;  %s2303_s13 = sphi %s2359_s13, %s3623_s13   ;;  %s2299_s12 = sphi %s2357_s12, %s3622_s12  }
   0xc   : > { %s27_s22 = sadd.s32 1, %s2319_s17  ;;  %s30_s23 = sadd.s32 1, %s2323_s18 }
   0xd   : > { %p28_p0 = scmp.ge.s32.totalorder %s27_s22, 2  ;;  %s109_s24 = sadd.s32 1, %s2307_s14 }
   0xe   : > { %p119_p1 = scmp.ne.s32.totalorder %s2307_s14, %s2303_s13  ;;  %p120_p2 = scmp.eq.s32.totalorder %s1914_s20, 3 }
   0xf   : > { %s3630_s22 = smov (%p28_p0, %s27_s22), 0  ;;  %s3632_s23 = smov (!%p28_p0, %s30_s23), %s2323_s18 }
  0x10   : > { %s105_s25 = ssub.s32 %s2319_s17, %s3630_s22  ;;  %p2409_p3 = por %p120_p2, %p119_p1 }
  0x11   : > { %p32_p4 = scmp.ge.s32.totalorder %s3632_s23, 2  ;;  %p125_p5 = scmp.ne.s32.totalorder %s2303_s13, %s2299_s12 }
  0x12   : > { %s3607_s26 = scalar_select %p2409_p3, 1, 0 }
  0x13   : > { %p126_p6 = scmp.eq.s32.totalorder %s1915_s21, 3  ;;  %p1916_p7 = scmp.ge.s32.totalorder %s2327_s19, 1 }
  0x14   : > { %s3634_s23 = smov (%p32_p4, %s3632_s23), 0  ;;  %p133_p9 = scmp.lt.s32.totalorder %s2327_s19, 5 }
  0x15   : > { %3608 = sst [smem:[#allocation11_spill]] %s3634_s23  ;;  %p2418_p8 = por %p126_p6, %p125_p5 }
  0x16   : > { %s104_s28 = ssub.s32 %s2323_s18, %s3634_s23  ;;  %p2425_p10 = pnand %p1916_p7, %p133_p9 }
  0x17   : > { %s3609_s27 = scalar_select %p2418_p8, 1, 0 }
  0x18   : > { %s106_s29 = sor.u32 %s105_s25, %s104_s28  ;;  %p2429_p12 = scmp.eq.s32.totalorder %s1914_s20, 0 }
  0x19   : > { %s3610_s30 = scalar_select %p2425_p10, 1, 0 }
  0x1a   : > { %p107_p11 = scmp.eq.s32.totalorder %s106_s29, 0  ;;  %p2100_p13 = pneg %p2425_p10 }
  0x1b   : > { %s3611_s4 = scalar_select %p2429_p12, 1, 0 }
  0x1c   : > { %s3612_s1 = sld [smem:[#allocation13_spill]]  ;;  %p2443_p0 = pnand %p2429_p12, %p2100_p13 }
  0x1d   : > { %s2439_s8 = scalar_select %p107_p11, %s2307_s14, %s109_s24  }
  0x1e   : > { %s3614_s2 = sld [smem:[#allocation14_spill]]  ;;  %p2197_p2 = pneg %p2443_p0 }
  0x22   : > { %s146_s7 = sshll.u32 %s3612_s1, 4  ;;  %s147_s7 = int_to_ptr.vmem [resolvable:$true] %s146_s7 }
  0x23   : > { %s2195_s21 = scalar_lea.vmem %s147_s7, 32  ;;  %p2203_p6 = scmp.lt.s32.totalorder %s147_s7, %s147_s7 }
  0x24   : > { %s157_s20 = sshll.u32 %s3614_s2, 4  ;;  %p2196_p1 = scmp.ne.s32.totalorder %s147_s7, %s2195_s21  ;;  %s158_s20 = int_to_ptr.vmem [resolvable:$true] %s157_s20 }
  0x25   : > { %p2204_p7 = scmp.lt.s32.totalorder %s2195_s21, %s2195_s21 }
  0x26   : > { %p2198_p4 = pnand %p2197_p2, %p2196_p1 }
  0x27   : > { %p2205_p9 = por %p2204_p7, %p2203_p6 }
  0x28   : > { %p2199_p5 = pneg %p2198_p4 }
  0x2a   : > { %p2206_p11 = pnand %p2205_p9, %p2199_p5 }
  0x2c   : > { %2209 = shalt.err (!%p2206_p11)
}
  0x2d   : > { %s2329_s24 = smov [#allocation2]   ;;  %s2210_s25 = scalar_lea.vmem %s158_s20, 16 }
  0x2e   : > { %2103 = dma.vmem_to_smem (!%p2443_p0), %s147_s7, 32, %s2329_s24, [#allocation4]  }
  0x2f   : > { %p2211_p13 = scmp.ne.s32.totalorder %s158_s20, %s2210_s25  ;;  %p2218_p12 = scmp.lt.s32.totalorder %s158_s20, %s158_s20 }
  0x30   : > { %p2219_p10 = scmp.lt.s32.totalorder %s2210_s25, %s2210_s25 }
  0x31   : > { %p2213_p8 = pnand %p2211_p13, %p2197_p2 }
  0x32   : > { %p2220_p1 = por %p2219_p10, %p2218_p12 }
  0x33   : > { %p2214_p3 = pneg %p2213_p8 }
  0x35   : > { %p2221_p4 = pnand %p2220_p1, %p2214_p3 }
  0x37   : > { %2224 = shalt.err (!%p2221_p4)
}
  0x38   : > { %s2330_s28 = smov [#allocation5]   ;;  %p3615_p5 = scmp.ne.s32.totalorder %s3610_s30, 0 }
  0x39   : > { %2106 = dma.vmem_to_smem (!%p2443_p0), %s158_s20, 16, %s2330_s28, [#allocation6]  }
  0x3a   : > { %182 = sbr.rel (%p3615_p5) target bundleno = 415 (0x19f), region = 32  ;;  %p3616_p6 = scmp.ne.s32.totalorder (!%p3615_p5), %s3611_s4, 0 }
  0x41   : > { %2286 = dma.done.wait (%p3616_p6), [#allocation4], 32  }
  0x42   : > { %2288 = vsyncadd (%p3616_p6), [#allocation4], 4294967264 }
  0x43   : > { %2290 = dma.done.wait (%p3616_p6), [#allocation6], 16  }
  0x44   : > { %2292 = vsyncadd (%p3616_p6), [#allocation6], 4294967280 }
  0x45   : > { %192 = sfence }
  0x46   : > { %p215_p3 = scmp.lt.s32.totalorder %s2315_s16, 1  ;;  %p217_p8 = scmp.lt.s32.totalorder %s2311_s15, 1  ;;  %vm320_vm0 = vcmask 1046528   ;;  %vm469_vm1 = vcmask 1045504   ;;  %vm1758_vm4 = vcmask 130048  }
  0x47   : > { %s1935_s29 = sld [smem:[#allocation2 + $0x49]]  ;;  %s1936_s10 = sld [smem:[#allocation2 + $0x6d]] }
  0x48   : > { %s216_s30 = scalar_select %p215_p3, %s2315_s16, 1 }
  0x49   : > { %s218_s5 = scalar_select %p217_p8, %s2311_s15, 1 }
  0x4a   : > { %s1925_s6 = sshll.u32 %s216_s30, 4  ;;  %s1933_s7 = sld [smem:[#allocation2 + $0x1]] }
  0x4b   : > { %s1924_s9 = sshll.u32 %s218_s5, 3  ;;  %s1934_s20 = sld [smem:[#allocation2 + $0x25]] }
  0x4c   : > { %s221_s11 = sadd.s32 %s1925_s6, %s1924_s9  ;;  %s3617_s0 = sld [smem:[#allocation12_spill]] }
  0x4d   : > { %s1926_s21 = sshll.u32 %s221_s11, 3  ;;  %v267_v0 = vstv %s1935_s29  ;;  %s1938_s28 = sld [smem:[#allocation2 + $0x26]]  ;;  %v275_v5 = vstv %s1936_s10 }
  0x4e   : > { %s1937_s1 = sld [smem:[#allocation2 + $0x2]]  ;;  %s2478_s2 = sld [smem:[#allocation2 + $0x6e]] }
  0x4f   : > { %s2481_s30 = sld [smem:[#allocation2 + $0x4a]]  ;;  %s1946_s5 = sld [smem:[#allocation2 + $0x28]] }
  0x50   : > { %v251_v3 = vstv %s1933_s7  ;;  %s1945_s29 = sld [smem:[#allocation2 + $0x4]]  ;;  %s2484_s6 = sld [smem:[#allocation2 + $0x70]] }
  0x51   : > { %s3601_s9 = smov 127   ;;  %v259_v7 = vstv %s1934_s20  ;;  %s2488_s11 = sld [smem:[#allocation2 + $0x4c]] }
  0x52   : > { %s2473_s25 = scalar_lea.vmem %s3617_s0, %s1926_s21  ;;  %s2492_s7 = sld [smem:[#allocation2 + $0x29]] }
  0x53   : > { %v2476_v1 = vld [vmem:[%s2473_s25] sm:$0xff]  ;;  %v291_v9 = vstv %s1938_s28  ;;  %v2495_v10 = vld [vmem:[%s2473_s25 + $0x8] sm:$0x3]  ;;  %s2497_s10 = sld [smem:[#allocation2 + $0x5]]  ;;  %s2524_s21 = sld [smem:[#allocation2 + $0x2b]] }
  0x54   : > { %v268_v2 = vmul.f32 %v267_v0, %v2476_v1  ;;  %v252_v4 = vmul.f32 %v251_v3, %v2476_v1  ;;  %v276_v6 = vmul.f32 %v275_v5, %v2476_v1  ;;  %v260_v8 = vmul.f32 %v259_v7, %v2476_v1  ;;  %s2513_s20 = sld [smem:[#allocation2 + $0x4d]]  ;;  %s2529_s4 = sld [smem:[#allocation2 + $0x7]] }
  0x55   : > { %v283_v11 = vstv %s1937_s1  ;;  %v292_v12 = vmul.f32 %v291_v9, %v2476_v1  ;;  %v307_v14 = vstv %s2478_s2  ;;  %v373_v15 = vstv %s1946_s5  ;;  %s2507_s1 = sld [smem:[#allocation2 + $0x71]]  ;;  %s2332_s2 = smov 126  }
  0x56   : > { %270 = vrot.lane.b32.xlu1 %v268_v2, %s3601_s9  ;;  %254 = vrot.lane.b32.xlu0 %v252_v4, %s3601_s9  ;;  %v284_v13 = vmul.f32 %v283_v11, %v2476_v1  ;;  %v299_v16 = vstv %s2481_s30  ;;  %v374_v17 = vmul.f32 %v373_v15, %v2476_v1  ;;  %v375_v18 = vmul.f32 %v373_v15, %v2495_v10  ;;  %s2537_s24 = sld [smem:[#allocation2 + $0x73]]  ;;  %s2539_s28 = sld [smem:[#allocation2 + $0x4f]] }
  0x57   : > { %v360_v19 = vstv %s1945_s29  ;;  %v399_v22 = vstv %s2484_s6  ;;  %v386_v23 = vstv %s2488_s11  ;;  %v308_v24 = vmul.f32 %v307_v14, %v2476_v1  ;;  %s2552_s30 = sld [smem:[#allocation2 + $0x2c]]  ;;  %s2555_s5 = sld [smem:[#allocation2 + $0x8]] }
  0x58   : > { %v361_v20 = vmul.f32 %v360_v19, %v2476_v1  ;;  %v362_v21 = vmul.f32 %v360_v19, %v2495_v10  ;;  %v300_v25 = vmul.f32 %v299_v16, %v2476_v1  ;;  %v378_v26 = vrot.slane %v374_v17, 1  ;;  %s2567_s29 = sld [smem:[#allocation2 + $0x74]]  ;;  %s2569_s6 = sld [smem:[#allocation2 + $0x50]] }
  0x59   : > { %v379_v27 = vrot.slane %v375_v18, 1  ;;  %v400_v28 = vmul.f32 %v399_v22, %v2476_v1  ;;  %v401_v29 = vmul.f32 %v399_v22, %v2495_v10  ;;  %v425_v30 = vstv %s2492_s7  ;;  %s1972_s11 = sld [smem:[#allocation2 + $0x2e]]  ;;  %s1971_s7 = sld [smem:[#allocation2 + $0xa]] }
  0x5a   : > { %278 = vrot.lane.b32.xlu1 %v276_v6, %s3601_s9  ;;  %262 = vrot.lane.b32.xlu0 %v260_v8, %s3601_s9  ;;  %v365_v31 = vrot.slane %v361_v20, 1  ;;  %v366_v32 = vrot.slane %v362_v21, 1  ;;  %v387_v33 = vmul.f32 %v386_v23, %v2476_v1  ;;  %v388_v34 = vmul.f32 %v386_v23, %v2495_v10  ;;  %s2780_s0 = sld [smem:[#allocation5]]  ;;  %s2782_s23 = sld [smem:[#allocation2 + $0x5e]] }
  0x5b   : > { %v426_v35 = vmul.f32 %v425_v30, %v2476_v1  ;;  %v427_v36 = vmul.f32 %v425_v30, %v2495_v10  ;;  %v412_v37 = vstv %s2497_s10  ;;  %v380_v40 = vsel %vm320_vm0, %v378_v26, %v379_v27  ;;  %s1974_s10 = sld [smem:[#allocation2 + $0x76]]  ;;  %p3619_p12 = scmp.ne.s32.totalorder %s3607_s26, 0 }
  0x5c   : > { %v413_v38 = vmul.f32 %v412_v37, %v2476_v1  ;;  %v414_v39 = vmul.f32 %v412_v37, %v2495_v10  ;;  %v404_v41 = vrot.slane %v400_v28, 1  ;;  %v405_v42 = vrot.slane %v401_v29, 1 }
  0x5d   : > { %v451_v43 = vstv %s2507_s1  ;;  %v367_v44 = vsel %vm320_vm0, %v365_v31, %v366_v32  ;;  %v391_v45 = vrot.slane %v387_v33, 1  ;;  %v392_v46 = vrot.slane %v388_v34, 1  ;;  %s1973_s1 = sld [smem:[#allocation2 + $0x52]] }
  0x5e   : > { %294 = vrot.lane.b32.xlu1 %v292_v12, %s2332_s2  ;;  %286 = vrot.lane.b32.xlu0 %v284_v13, %s2332_s2  ;;  %v430_v47 = vrot.slane %v426_v35, 1  ;;  %v431_v48 = vrot.slane %v427_v36, 1  ;;  %v438_v49 = vstv %s2513_s20  ;;  %v417_v50 = vrot.slane %v413_v38, 1  ;;  %s1976_s20 = sld [smem:[#allocation2 + $0x2f]] }
  0x5f   : > { %v418_v51 = vrot.slane %v414_v39, 1  ;;  %v452_v52 = vmul.f32 %v451_v43, %v2476_v1  ;;  %v453_v53 = vmul.f32 %v451_v43, %v2495_v10  ;;  %v406_v54 = vsel %vm320_vm0, %v404_v41, %v405_v42 }
  0x60   : > { %v393_v55 = vsel %vm320_vm0, %v391_v45, %v392_v46  ;;  %v439_v56 = vmul.f32 %v438_v49, %v2476_v1  ;;  %v440_v57 = vmul.f32 %v438_v49, %v2495_v10  ;;  %v522_v58 = vstv %s2524_s21  ;;  %s2609_s21 = sld [smem:[#allocation2 + $0x31]] }
  0x61   : > { %v509_v59 = vstv %s2529_s4  ;;  %v432_v60 = vsel %vm320_vm0, %v430_v47, %v431_v48  ;;  %v419_v61 = vsel %vm320_vm0, %v417_v50, %v418_v51  ;;  %v456_v62 = vrot.slane %v452_v52, 1  ;;  %v2607_v51 = vld [vmem:[%s2473_s25 + $0x10] sm:$0xff]  ;;  %s2612_s4 = sld [smem:[#allocation2 + $0xb]] }
  0x62   : > { %310 = vrot.lane.b32.xlu1 %v308_v24, %s2332_s2  ;;  %302 = vrot.lane.b32.xlu0 %v300_v25, %s2332_s2  ;;  %v457_v63 = vrot.slane %v453_v53, 1  ;;  %v523_v0 = vmul.f32 %v522_v58, %v2476_v1  ;;  %v524_v2 = vmul.f32 %v522_v58, %v2495_v10  ;;  %v548_v3 = vstv %s2537_s24  ;;  %s2614_s24 = sld [smem:[#allocation2 + $0xd]] }
  0x63   : > { %v535_v4 = vstv %s2539_s28  ;;  %v443_v5 = vrot.slane %v439_v56, 1  ;;  %v444_v6 = vrot.slane %v440_v57, 1  ;;  %v510_v7 = vmul.f32 %v509_v59, %v2476_v1  ;;  %s2616_s28 = sld [smem:[#allocation2 + $0x77]] }
  0x64   : > { %v511_v8 = vmul.f32 %v509_v59, %v2495_v10  ;;  %v549_v9 = vmul.f32 %v548_v3, %v2476_v1  ;;  %v550_v11 = vmul.f32 %v548_v3, %v2495_v10  ;;  %v536_v12 = vmul.f32 %v535_v4, %v2476_v1 }
  0x65   : > { %v537_v13 = vmul.f32 %v535_v4, %v2495_v10  ;;  %v458_v14 = vsel %vm320_vm0, %v456_v62, %v457_v63  ;;  %v527_v15 = vrot.slane %v523_v0, 2  ;;  %v528_v16 = vrot.slane %v524_v2, 2  ;;  %v2639_v0 = vld [vmem:[%s2473_s25 + $0x18] sm:$0x3] }
  0x66   : > { %381 = vrot.lane.b32.xlu1 %v380_v40, %s3601_s9  ;;  %368 = vrot.lane.b32.xlu0 %v367_v44, %s3601_s9  ;;  %v445_v17 = vsel %vm320_vm0, %v443_v5, %v444_v6  ;;  %v514_v18 = vrot.slane %v510_v7, 2  ;;  %v515_v19 = vrot.slane %v511_v8, 2  ;;  %v574_v20 = vstv %s2552_s30  ;;  %s2620_s30 = sld [smem:[#allocation2 + $0x53]] }
  0x67   : > { %v561_v21 = vstv %s2555_s5  ;;  %v553_v22 = vrot.slane %v549_v9, 2  ;;  %v554_v23 = vrot.slane %v550_v11, 2  ;;  %v540_v24 = vrot.slane %v536_v12, 2  ;;  %s2622_s5 = sld [smem:[#allocation2 + $0x79]] }
  0x68   : > { %v541_v25 = vrot.slane %v537_v13, 2  ;;  %v529_v26 = vsel %vm469_vm1, %v527_v15, %v528_v16  ;;  %v575_v27 = vmul.f32 %v574_v20, %v2476_v1  ;;  %v576_v28 = vmul.f32 %v574_v20, %v2495_v10 }
  0x69   : > { %v516_v29 = vsel %vm469_vm1, %v514_v18, %v515_v19  ;;  %v562_v30 = vmul.f32 %v561_v21, %v2476_v1  ;;  %v563_v31 = vmul.f32 %v561_v21, %v2495_v10  ;;  %v600_v32 = vstv %s2567_s29  ;;  %s2626_s29 = sld [smem:[#allocation2 + $0x55]] }
  0x6a   : > { %407 = vrot.lane.b32.xlu1 %v406_v54, %s3601_s9  ;;  %394 = vrot.lane.b32.xlu0 %v393_v55, %s3601_s9  ;;  %v587_v33 = vstv %s2569_s6  ;;  %v555_v34 = vsel %vm469_vm1, %v553_v22, %v554_v23  ;;  %v542_v35 = vsel %vm469_vm1, %v540_v24, %v541_v25  ;;  %v579_v36 = vrot.slane %v575_v27, 2  ;;  %s2630_s6 = sld [smem:[#allocation2 + $0x32]] }
  0x6b   : > { %v580_v37 = vrot.slane %v576_v28, 2  ;;  %v601_v38 = vmul.f32 %v600_v32, %v2476_v1  ;;  %v602_v39 = vmul.f32 %v600_v32, %v2495_v10  ;;  %v566_v40 = vrot.slane %v562_v30, 2 }
  0x6c   : > { %v567_v41 = vrot.slane %v563_v31, 2  ;;  %v588_v42 = vmul.f32 %v587_v33, %v2476_v1  ;;  %v589_v43 = vmul.f32 %v587_v33, %v2495_v10  ;;  %v640_v52 = vstv %s1972_s11  ;;  %s2635_s11 = sld [smem:[#allocation2 + $0xe]] }
  0x6d   : > { %v581_v44 = vsel %vm469_vm1, %v579_v36, %v580_v37  ;;  %v605_v45 = vrot.slane %v601_v38, 2  ;;  %v606_v46 = vrot.slane %v602_v39, 2  ;;  %v632_v54 = vstv %s1971_s7  ;;  %s2653_s7 = sld [smem:[#allocation2 + $0x7a]] }
  0x6e   : > { %433 = vrot.lane.b32.xlu1 %v432_v60, %s2332_s2  ;;  %420 = vrot.lane.b32.xlu0 %v419_v61, %s2332_s2  ;;  %v568_v47 = vsel %vm469_vm1, %v566_v40, %v567_v41  ;;  %v592_v48 = vrot.slane %v588_v42, 2  ;;  %v593_v49 = vrot.slane %v589_v43, 2  ;;  %v641_v55 = vmul.f32 %v2607_v51, %v640_v52 }
  0x6f   : > { %v607_v50 = vsel %vm469_vm1, %v605_v45, %v606_v46  ;;  %v633_v56 = vmul.f32 %v2607_v51, %v632_v54  ;;  %v656_v57 = vstv %s1974_s10  ;;  %v648_v58 = vstv %s1973_s1  ;;  %s2655_s10 = sld [smem:[#allocation2 + $0x56]]  ;;  %s2666_s1 = sld [smem:[#allocation2 + $0x34]] }
  0x70   : > { %v594_v53 = vsel %vm469_vm1, %v592_v48, %v593_v49  ;;  %v657_v59 = vmul.f32 %v2607_v51, %v656_v57  ;;  %v649_v60 = vmul.f32 %v2607_v51, %v648_v58  ;;  %v672_v61 = vstv %s1976_s20  ;;  %s2670_s20 = sld [smem:[#allocation2 + $0x10]] }
  0x71   : > { %v753_v62 = vstv %s2609_s21  ;;  %v664_v63 = vstv %s2612_s4  ;;  %v740_v2 = vstv %s2614_s24  ;;  %v688_v3 = vstv %s2616_s28  ;;  %s2680_s21 = sld [smem:[#allocation2 + $0x7c]]  ;;  %s2684_s4 = sld [smem:[#allocation2 + $0x58]] }
  0x72   : > { %459 = vrot.lane.b32.xlu1 %v458_v14, %s2332_s2  ;;  %446 = vrot.lane.b32.xlu0 %v445_v17, %s2332_s2  ;;  %v673_v4 = vmul.f32 %v2607_v51, %v672_v61  ;;  %v680_v5 = vstv %s2620_s30  ;;  %v754_v6 = vmul.f32 %v2607_v51, %v753_v62  ;;  %v779_v7 = vstv %s2622_s5  ;;  %s2695_s24 = sld [smem:[#allocation2 + $0x35]]  ;;  %s2698_s28 = sld [smem:[#allocation2 + $0x11]] }
  0x73   : > { %v665_v8 = vmul.f32 %v2607_v51, %v664_v63  ;;  %v755_v9 = vmul.f32 %v2639_v0, %v753_v62  ;;  %v741_v11 = vmul.f32 %v2607_v51, %v740_v2  ;;  %v742_v12 = vmul.f32 %v2639_v0, %v740_v2  ;;  %s2705_s30 = sld [smem:[#allocation2 + $0x7d]]  ;;  %s2712_s5 = sld [smem:[#allocation2 + $0x59]] }
  0x74   : > { %v780_v13 = vmul.f32 %v2607_v51, %v779_v7  ;;  %v781_v14 = vmul.f32 %v2639_v0, %v779_v7  ;;  %v766_v15 = vstv %s2626_s29  ;;  %v689_v16 = vmul.f32 %v2607_v51, %v688_v3  ;;  %s2734_s29 = sld [smem:[#allocation2 + $0x3a]] }
  0x75   : > { %v681_v17 = vmul.f32 %v2607_v51, %v680_v5  ;;  %v758_v18 = vrot.slane %v754_v6, 1  ;;  %v805_v19 = vstv %s2630_s6  ;;  %v759_v20 = vrot.slane %v755_v9, 1  ;;  %s2739_s6 = sld [smem:[#allocation2 + $0x16]] }
  0x76   : > { %530 = vrot.lane.b32.xlu1 %v529_v26, %s3601_s9  ;;  %517 = vrot.lane.b32.xlu0 %v516_v29, %s3601_s9  ;;  %v745_v21 = vrot.slane %v741_v11, 1  ;;  %v746_v22 = vrot.slane %v742_v12, 1  ;;  %v792_v23 = vstv %s2635_s11  ;;  %v767_v24 = vmul.f32 %v2607_v51, %v766_v15  ;;  %s2744_s11 = sld [smem:[#allocation2 + $0x37]] }
  0x77   : > { %v768_v25 = vmul.f32 %v2639_v0, %v766_v15  ;;  %v784_v26 = vrot.slane %v780_v13, 1  ;;  %v785_v27 = vrot.slane %v781_v14, 1  ;;  %v806_v28 = vmul.f32 %v2607_v51, %v805_v19 }
  0x78   : > { %v807_v29 = vmul.f32 %v2639_v0, %v805_v19  ;;  %v793_v30 = vmul.f32 %v2607_v51, %v792_v23  ;;  %v794_v31 = vmul.f32 %v2639_v0, %v792_v23  ;;  %v760_v32 = vsel %vm320_vm0, %v758_v18, %v759_v20 }
  0x79   : > { %v747_v33 = vsel %vm320_vm0, %v745_v21, %v746_v22  ;;  %v831_v36 = vstv %s2653_s7  ;;  %v818_v37 = vstv %s2655_s10  ;;  %v786_v38 = vsel %vm320_vm0, %v784_v26, %v785_v27  ;;  %s2746_s7 = sld [smem:[#allocation2 + $0x13]]  ;;  %s2750_s10 = sld [smem:[#allocation2 + $0x7f]] }
  0x7a   : > { %556 = vrot.lane.b32.xlu1 %v555_v34, %s3601_s9  ;;  %543 = vrot.lane.b32.xlu0 %v542_v35, %s3601_s9  ;;  %v771_v34 = vrot.slane %v767_v24, 1  ;;  %v772_v35 = vrot.slane %v768_v25, 1  ;;  %v810_v39 = vrot.slane %v806_v28, 1  ;;  %v811_v40 = vrot.slane %v807_v29, 1 }
  0x7b   : > { %v797_v41 = vrot.slane %v793_v30, 1  ;;  %v798_v42 = vrot.slane %v794_v31, 1  ;;  %v832_v43 = vmul.f32 %v2607_v51, %v831_v36  ;;  %v819_v45 = vmul.f32 %v2607_v51, %v818_v37 }
  0x7c   : > { %v901_v46 = vstv %s2666_s1  ;;  %v820_v48 = vmul.f32 %v2639_v0, %v818_v37  ;;  %v888_v49 = vstv %s2670_s20  ;;  %v927_v58 = vstv %s2680_s21  ;;  %s2752_s1 = sld [smem:[#allocation2 + $0x5b]]  ;;  %s2754_s20 = sld [smem:[#allocation2 + $0x38]] }
  0x7d   : > { %v799_v52 = vsel %vm320_vm0, %v797_v41, %v798_v42  ;;  %v903_v54 = vmul.f32 %v2639_v0, %v901_v46  ;;  %v823_v57 = vrot.slane %v819_v45, 1  ;;  %v890_v61 = vmul.f32 %v2639_v0, %v888_v49  ;;  %s2756_s21 = sld [smem:[#allocation2 + $0x48]]  ;;  %v2773_v41 = vld [vmem:[%s2473_s25 + $0x28] sm:$0x3]  ;;  %v2787_v45 = vld [vmem:[%s2473_s25 + $0x20] sm:$0xff] }
  0x7e   : > { %582 = vrot.lane.b32.xlu1 %v581_v44, %s2332_s2  ;;  %569 = vrot.lane.b32.xlu0 %v568_v47, %s2332_s2  ;;  %v833_v44 = vmul.f32 %v2639_v0, %v831_v36  ;;  %v773_v47 = vsel %vm320_vm0, %v771_v34, %v772_v35  ;;  %v914_v62 = vstv %s2684_s4  ;;  %v928_v3 = vmul.f32 %v2607_v51, %v927_v58  ;;  %s2759_s4 = sld [smem:[#allocation2 + $0x14]] }
  0x7f   : > { %v907_v2 = vrot.slane %v903_v54, 2  ;;  %v915_v6 = vmul.f32 %v2607_v51, %v914_v62  ;;  %v916_v7 = vmul.f32 %v2639_v0, %v914_v62  ;;  %v894_v11 = vrot.slane %v890_v61, 2 }
  0x80   : > { %v953_v12 = vstv %s2695_s24  ;;  %v940_v13 = vstv %s2698_s28  ;;  %v932_v15 = vrot.slane %v928_v3, 2  ;;  %v966_v25 = vstv %s2712_s5  ;;  %s2761_s24 = sld [smem:[#allocation2]]  ;;  %s2770_s5 = sld [smem:[#allocation2 + $0x82]] }
  0x81   : > { %v919_v18 = vrot.slane %v915_v6, 2  ;;  %v920_v19 = vrot.slane %v916_v7, 2  ;;  %v954_v20 = vmul.f32 %v2607_v51, %v953_v12  ;;  %v955_v21 = vmul.f32 %v2639_v0, %v953_v12  ;;  %s2765_s28 = sld [smem:[#allocation2 + $0x80]] }
  0x82   : > { %608 = vrot.lane.b32.xlu1 %v607_v50, %s2332_s2  ;;  %595 = vrot.lane.b32.xlu0 %v594_v53, %s2332_s2  ;;  %v812_v50 = vsel %vm320_vm0, %v810_v39, %v811_v40  ;;  %v902_v53 = vmul.f32 %v2607_v51, %v901_v46  ;;  %v941_v23 = vmul.f32 %v2607_v51, %v940_v13  ;;  %v1132_v42 = vstv %s2734_s29  ;;  %s2798_s29 = sld [smem:[#allocation5 + $0x3]] }
  0x83   : > { %v942_v24 = vmul.f32 %v2639_v0, %v940_v13  ;;  %v921_v28 = vsel %vm469_vm1, %v919_v18, %v920_v19  ;;  %v958_v29 = vrot.slane %v954_v20, 2  ;;  %v959_v30 = vrot.slane %v955_v21, 2 }
  0x84   : > { %v906_v63 = vrot.slane %v902_v53, 2  ;;  %v967_v34 = vmul.f32 %v2607_v51, %v966_v25  ;;  %v968_v35 = vmul.f32 %v2639_v0, %v966_v25  ;;  %v1019_v46 = vstv %s2744_s11  ;;  %s2807_s11 = sld [smem:[#allocation2 + $0x17]] }
  0x85   : > { %v1043_v61 = vstv %s2759_s4  ;;  %s3618_s4 = smov 127   ;;  %v225_v13 = vstv %s2780_s0  ;;  %s2847_s0 = sld [smem:[#allocation2 + $0x19]] }
  0x86   : > { %643 = vrot.lane.b32.xlu1 %v641_v55, %s3601_s9  ;;  %635 = vrot.lane.b32.xlu0 %v633_v56, %s3601_s9  ;;  %v836_v55 = vrot.slane %v832_v43, 1  ;;  %v837_v56 = vrot.slane %v833_v44, 1  ;;  %v908_v14 = vsel %vm469_vm1, %v906_v63, %v907_v2  ;;  %v971_v39 = vrot.slane %v967_v34, 2 }
  0x87   : > { %v972_v40 = vrot.slane %v968_v35, 2  ;;  %v1119_v43 = vstv %s2739_s6  ;;  %s2800_s6 = sld [smem:[#allocation2 + $0x3b]]  ;;  %v1067_v62 = vstv %s2765_s28  ;;  %s2876_s28 = sld [smem:[#allocation2 + $0x85]] }
  0x88   : > { %v838_v5 = vsel %vm320_vm0, %v836_v55, %v837_v56  ;;  %v1120_v53 = vmul.f32 %v2787_v45, %v1119_v43  ;;  %v1121_v54 = vmul.f32 %v2773_v41, %v1119_v43  ;;  %v243_v55 = vstv %s2756_s21  ;;  %s2818_s21 = sld [smem:[#allocation2 + $0x5f]] }
  0x89   : > { %v1020_v56 = vmul.f32 %v2787_v45, %v1019_v46  ;;  %v1068_v19 = vmul.f32 %v2787_v45, %v1067_v62 }
  0x8a   : > { %659 = vrot.lane.b32.xlu1 %v657_v59, %s3601_s9  ;;  %651 = vrot.lane.b32.xlu0 %v649_v60, %s3601_s9  ;;  %v824_v59 = vrot.slane %v820_v48, 1  ;;  %v889_v60 = vmul.f32 %v2607_v51, %v888_v49  ;;  %v1011_v48 = vstv %s2746_s7  ;;  %v1133_v49 = vmul.f32 %v2787_v45, %v1132_v42  ;;  %s2809_s7 = sld [smem:[#allocation2 + $0x83]] }
  0x8b   : > { %v1124_v6 = vrot.slane %v1120_v53, 1  ;;  %v1125_v7 = vrot.slane %v1121_v54, 1 }
  0x8c   : > { %v893_v9 = vrot.slane %v889_v60, 2  ;;  %v1012_v60 = vmul.f32 %v2787_v45, %v1011_v48  ;;  %v1137_v2 = vrot.slane %v1133_v49, 1 }
  0x8e   : > { %675 = vrot.lane.b32.xlu1 %v673_v4, %s2332_s2  ;;  %667 = vrot.lane.b32.xlu0 %v665_v8, %s2332_s2  ;;  %v929_v4 = vmul.f32 %v2639_v0, %v927_v58  ;;  %v825_v8 = vsel %vm320_vm0, %v823_v57, %v824_v59  ;;  %v895_v22 = vsel %vm469_vm1, %v893_v9, %v894_v11  ;;  %v1027_v57 = vstv %s2752_s1  ;;  %s2822_s1 = sld [smem:[#allocation2 + $0x24]] }
  0x8f   : > { %v1051_v58 = vstv %s2754_s20  ;;  %v235_v59 = vstv %s2761_s24  ;;  %s2824_s20 = sld [smem:[#allocation2 + $0x3d]]  ;;  %v1028_v12 = vmul.f32 %v2787_v45, %v1027_v57  ;;  %v1197_v34 = vstv %s2818_s21  ;;  %s2870_s24 = sld [smem:[#allocation2 + $0x3]] }
  0x90   : > { %v236_v9 = vmul.f32 %v235_v59, %v2476_v1  ;;  %v1198_v46 = vmul.f32 %v2787_v45, %v1197_v34  ;;  %s2942_s21 = sld [smem:[#allocation2 + $0x40]] }
  0x92   : > { %691 = vrot.lane.b32.xlu1 %v689_v16, %s2332_s2  ;;  %683 = vrot.lane.b32.xlu0 %v681_v17, %s2332_s2  ;;  %v933_v16 = vrot.slane %v929_v4, 2  ;;  %v979_v17 = vstv %s2705_s30  ;;  %s2767_s30 = sld [smem:[#allocation2 + $0x5c]]  ;;  %v244_v4 = vmul.f32 %v243_v55, %v2476_v1 }
  0x93   : > { %v980_v27 = vmul.f32 %v2607_v51, %v979_v17  ;;  %v981_v31 = vmul.f32 %v2639_v0, %v979_v17  ;;  %v960_v0 = vsel %vm469_vm1, %v958_v29, %v959_v30  ;;  %v1171_v29 = vstv %s2807_s11  ;;  %s2902_s11 = sld [smem:[#allocation2 + $0x1a]] }
  0x94   : > { %v934_v26 = vsel %vm469_vm1, %v932_v15, %v933_v16  ;;  %v1052_v15 = vmul.f32 %v2787_v45, %v1051_v58  ;;  %v1044_v16 = vmul.f32 %v2787_v45, %v1043_v61  ;;  %v1210_v30 = vstv %s2809_s7  ;;  %s2929_s7 = sld [smem:[#allocation2 + $0x86]] }
  0x95   : > { %v984_v36 = vrot.slane %v980_v27, 2  ;;  %v985_v37 = vrot.slane %v981_v31, 2  ;;  %v239_v35 = vstv %s2822_s1  ;;  %s2952_s1 = sld [smem:[#allocation2 + $0x2a]] }
  0x96   : > { %761 = vrot.lane.b32.xlu1 %v760_v32, %s3601_s9  ;;  %748 = vrot.lane.b32.xlu0 %v747_v33, %s3601_s9  ;;  %v945_v32 = vrot.slane %v941_v23, 2  ;;  %v946_v33 = vrot.slane %v942_v24, 2  ;;  %v2850_v23 = vsel %vm320_vm0, %v1124_v6, %v1125_v7  ;;  %v2852_v24 = vadd.f32 %v236_v9, %v225_v13 }
  0x97   : > { %v986_v44 = vsel %vm469_vm1, %v984_v36, %v985_v37  ;;  %v1280_v37 = vstv %s2824_s20  ;;  %v240_v53 = vmul.f32 %v239_v35, %v2476_v1  ;;  %s2959_s20 = sld [smem:[#allocation2 + $0x6]] }
  0x98   : > { %v1059_v63 = vstv %s2767_s30  ;;  %s2881_s30 = sld [smem:[#allocation2 + $0x61]] }
  0x99   : > { %v1060_v20 = vmul.f32 %v2787_v45, %v1059_v63  ;;  %v1202_v63 = vrot.slane %v1198_v46, 1 }
  0x9a   : > { %787 = vrot.lane.b32.xlu1 %v786_v38, %s3601_s9  ;;  %774 = vrot.lane.b32.xlu0 %v773_v47, %s3601_s9  ;;  %v947_v38 = vsel %vm469_vm1, %v945_v32, %v946_v33  ;;  %v973_v47 = vsel %vm469_vm1, %v971_v39, %v972_v40  ;;  %v1173_v39 = vmul.f32 %v2773_v41, %v1171_v29 }
  0x9b   : > { %v1211_v40 = vmul.f32 %v2787_v45, %v1210_v30 }
  0x9c   : > { %v1177_v58 = vrot.slane %v1173_v39, 1 }
  0x9d   : > { %v1215_v59 = vrot.slane %v1211_v40, 1 }
  0x9e   : > { %813 = vrot.lane.b32.xlu1 %v812_v50, %s2332_s2  ;;  %800 = vrot.lane.b32.xlu0 %v799_v52, %s2332_s2  ;;  %v1134_v50 = vmul.f32 %v2773_v41, %v1132_v42  ;;  %v1035_v52 = vstv %s2750_s10  ;;  %s2816_s10 = sld [smem:[#allocation2 + $0x6c]]  ;;  %v1212_v42 = vmul.f32 %v2773_v41, %v1210_v30 }
  0x9f   : > { %v1036_v11 = vmul.f32 %v2787_v45, %v1035_v52  ;;  %v1282_v52 = vmul.f32 %v2773_v41, %v1280_v37 }
  0xa0   : > { %v1138_v3 = vrot.slane %v1134_v50, 1  ;;  %v1281_v50 = vmul.f32 %v2787_v45, %v1280_v37 }
  0xa2   : > { %839 = vrot.lane.b32.xlu1 %v838_v5, %s2332_s2  ;;  %826 = vrot.lane.b32.xlu0 %v825_v8, %s2332_s2  ;;  %v1158_v5 = vstv %s2770_s5  ;;  %v2843_v21 = vsel %vm320_vm0, %v1137_v2, %v1138_v3  ;;  %s2888_s5 = sld [smem:[#allocation2 + $0x6f]]  ;;  %v1285_v3 = vrot.slane %v1281_v50, 2 }
  0xa3   : > { %v1159_v17 = vmul.f32 %v2787_v45, %v1158_v5  ;;  %v1160_v18 = vmul.f32 %v2773_v41, %v1158_v5 }
  0xa4   : > { %v247_v33 = vstv %s2816_s10  ;;  %s2940_s10 = sld [smem:[#allocation2 + $0x62]] }
  0xa5   : > { %v1163_v31 = vrot.slane %v1159_v17, 1  ;;  %v1164_v32 = vrot.slane %v1160_v18, 1  ;;  %v248_v48 = vmul.f32 %v247_v33, %v2476_v1 }
  0xa6   : > { %909 = vrot.lane.b32.xlu1 %v908_v14, %s3601_s9  ;;  %896 = vrot.lane.b32.xlu0 %v895_v22, %s3601_s9  ;;  %v1145_v14 = vstv %s2782_s23  ;;  %s2864_s23 = sld [smem:[#allocation2 + $0x27]] }
  0xa7   : > { %v1146_v25 = vmul.f32 %v2787_v45, %v1145_v14  ;;  %v1147_v27 = vmul.f32 %v2773_v41, %v1145_v14  ;;  %v1165_v61 = vsel %vm320_vm0, %v1163_v31, %v1164_v32 }
  0xa9   : > { %v1150_v43 = vrot.slane %v1146_v25, 1 }
  0xaa   : > { %935 = vrot.lane.b32.xlu1 %v934_v26, %s3601_s9  ;;  %922 = vrot.lane.b32.xlu0 %v921_v28, %s3601_s9  ;;  %s2776_s9 = sld [smem:[#allocation5 + $0x2]]  ;;  %v1184_v26 = vstv %s2800_s6  ;;  %v231_v28 = vstv %s2798_s29  ;;  %s2892_s29 = sld [smem:[#allocation2 + $0x4b]] }
  0xab   : > { %v1186_v36 = vmul.f32 %v2773_v41, %v1184_v26  ;;  %s2894_s6 = sld [smem:[#allocation2 + $0x3e]]  ;;  %v2904_v7 = vadd.f32 %v248_v48, %v231_v28 }
  0xac   : > { %v327_v6 = vstv %s2864_s23  ;;  %s2981_s23 = sld [smem:[#allocation2 + $0x88]] }
  0xad   : > { %v1190_v55 = vrot.slane %v1186_v36, 1  ;;  %v328_v17 = vmul.f32 %v327_v6, %v2476_v1  ;;  %v329_v18 = vmul.f32 %v327_v6, %v2495_v10 }
  0xae   : > { %961 = vrot.lane.b32.xlu1 %v960_v0, %s2332_s2  ;;  %948 = vrot.lane.b32.xlu0 %v947_v38, %s2332_s2  ;;  %v1185_v0 = vmul.f32 %v2787_v45, %v1184_v26  ;;  %v1172_v38 = vmul.f32 %v2787_v45, %v1171_v29 }
  0xaf   : > { %v333_v36 = vrot.slane %v329_v18, 1  ;;  %v2979_v18 = vld [vmem:[%s2473_s25 + $0x30] sm:$0xff] }
  0xb0   : > { %v229_v8 = vstv %s2776_s9  ;;  %s2838_s9 = sld [smem:[#allocation5 + $0x1]]  ;;  %v1189_v54 = vrot.slane %v1185_v0, 1  ;;  %v1176_v57 = vrot.slane %v1172_v38, 1  ;;  %v338_v31 = vstv %s2892_s29  ;;  %s3019_s29 = sld [smem:[#allocation2 + $0x1d]] }
  0xb1   : > { %v2845_v22 = vadd.f32 %v244_v4, %v229_v8  ;;  %v1286_v4 = vrot.slane %v1282_v52, 2  ;;  %v1332_v35 = vstv %s2894_s6  ;;  %v332_v0 = vrot.slane %v328_v17, 1  ;;  %s3022_s6 = sld [smem:[#allocation2 + $0x1f]] }
  0xb2   : > { %987 = vrot.lane.b32.xlu1 %v986_v44, %s2332_s2  ;;  %974 = vrot.lane.b32.xlu0 %v973_v47, %s2332_s2  ;;  %v1151_v44 = vrot.slane %v1147_v27, 1  ;;  %v1199_v47 = vmul.f32 %v2773_v41, %v1197_v34  ;;  %v1191_v9 = vsel %vm320_vm0, %v1189_v54, %v1190_v55  ;;  %v349_v27 = vstv %s2888_s5  ;;  %s3016_s5 = sld [smem:[#allocation2 + $0x41]] }
  0xb3   : > { %v350_v37 = vmul.f32 %v349_v27, %v2476_v1  ;;  %v351_v38 = vmul.f32 %v349_v27, %v2495_v10  ;;  %v339_v40 = vmul.f32 %v338_v31, %v2476_v1  ;;  %v1334_v55 = vmul.f32 %v2773_v41, %v1332_v35 }
  0xb4   : > { %v1152_v62 = vsel %vm320_vm0, %v1150_v43, %v1151_v44  ;;  %v1203_v2 = vrot.slane %v1199_v47, 1  ;;  %v1319_v43 = vstv %s2902_s11  ;;  %s3031_s11 = sld [smem:[#allocation2 + $0x89]] }
  0xb6   : > { %1022 = vrot.lane.b32.xlu1 %v1020_v56, %s3618_s4  ;;  %1014 = vrot.lane.b32.xlu0 %v1012_v60, %s3618_s4  ;;  %v227_v49 = vstv %s2838_s9  ;;  %v1267_v56 = vstv %s2847_s0  ;;  %v1216_v60 = vrot.slane %v1212_v42, 1  ;;  %v340_v42 = vmul.f32 %v338_v31, %v2495_v10  ;;  %s2963_s9 = sld [smem:[#allocation2 + $0x1c]]  ;;  %s2970_s0 = sld [smem:[#allocation2 + $0x72]] }
  0xb7   : > { %v1268_v5 = vmul.f32 %v2787_v45, %v1267_v56  ;;  %v241_v8 = vadd.f32 %v240_v53, %v227_v49  ;;  %v1269_v14 = vmul.f32 %v2773_v41, %v1267_v56  ;;  %v1333_v49 = vmul.f32 %v2787_v45, %v1332_v35 }
  0xb8   : > { %v2910_v13 = vsel %vm320_vm0, %v1215_v59, %v1216_v60  ;;  %v1320_v56 = vmul.f32 %v2787_v45, %v1319_v43  ;;  %v343_v59 = vrot.slane %v339_v40, 1  ;;  %v344_v60 = vrot.slane %v340_v42, 1 }
  0xb9   : > { %v1272_v25 = vrot.slane %v1268_v5, 2  ;;  %v464_v35 = vstv %s2959_s20  ;;  %s3059_s20 = sld [smem:[#allocation2 + $0x67]] }
  0xba   : > { %1038 = vrot.lane.b32.xlu1 %v1036_v11, %s3618_s4  ;;  %1030 = vrot.lane.b32.xlu0 %v1028_v12, %s3618_s4  ;;  %v315_v11 = vstv %s2870_s24  ;;  %v1178_v12 = vsel %vm320_vm0, %v1176_v57, %v1177_v58  ;;  %v1321_v57 = vmul.f32 %v2773_v41, %v1319_v43  ;;  %s2989_s24 = sld [smem:[#allocation2 + $0x4e]] }
  0xbb   : > { %v316_v26 = vmul.f32 %v315_v11, %v2476_v1  ;;  %v317_v28 = vmul.f32 %v315_v11, %v2495_v10  ;;  %v354_v1 = vrot.slane %v350_v37, 1  ;;  %v355_v10 = vrot.slane %v351_v38, 1  ;;  %v2188_v38 = vld [vmem:[%s2473_s25 + $0x8] sm:$0x3] }
  0xbc   : > { %v1398_v11 = vstv %s2942_s21  ;;  %s3039_s21 = sld [smem:[#allocation2 + $0x2d]] }
  0xbd   : > { %v321_v39 = vrot.slane %v316_v26, 1  ;;  %v322_v46 = vrot.slane %v317_v28, 1 }
  0xbe   : > { %1054 = vrot.lane.b32.xlu1 %v1052_v15, %s2332_s2  ;;  %1046 = vrot.lane.b32.xlu0 %v1044_v16, %s2332_s2  ;;  %v1306_v15 = vstv %s2876_s28  ;;  %v2917_v16 = vsel %vm320_vm0, %v1202_v63, %v1203_v2  ;;  %v334_v63 = vsel %vm320_vm0, %v332_v0, %v333_v36  ;;  %s2996_s28 = sld [smem:[#allocation2 + $0x64]]  ;;  %v2187_v36 = vld [vmem:[%s2473_s25] sm:$0xff] }
  0xbf   : > { %v1307_v29 = vmul.f32 %v2787_v45, %v1306_v15  ;;  %v1308_v30 = vmul.f32 %v2773_v41, %v1306_v15  ;;  %v323_v2 = vsel %vm320_vm0, %v321_v39, %v322_v46  ;;  %v1325_v15 = vrot.slane %v1321_v57, 2 }
  0xc0   : > { %v465_v46 = vmul.f32 %v2187_v36, %v464_v35 }
  0xc1   : > { %v1311_v47 = vrot.slane %v1307_v29, 2  ;;  %v1312_v48 = vrot.slane %v1308_v30, 2 }
  0xc2   : > { %1070 = vrot.lane.b32.xlu1 %v1068_v19, %s2332_s2  ;;  %1062 = vrot.lane.b32.xlu0 %v1060_v20, %s2332_s2  ;;  %v1293_v19 = vstv %s2881_s30  ;;  %v2925_v20 = vsel %vm469_vm1, %v1285_v3, %v1286_v4  ;;  %v1337_v4 = vrot.slane %v1333_v49, 2  ;;  %s3010_s30 = sld [smem:[#allocation2 + $0x43]] }
  0xc3   : > { %v1294_v33 = vmul.f32 %v2787_v45, %v1293_v19  ;;  %v1295_v34 = vmul.f32 %v2773_v41, %v1293_v19  ;;  %v1313_v3 = vsel %vm469_vm1, %v1311_v47, %v1312_v48  ;;  %v466_v47 = vmul.f32 %v2188_v38, %v464_v35 }
  0xc4   : > { %v498_v48 = vstv %s2970_s0  ;;  %s3077_s0 = sld [smem:[#allocation2 + $0x20]] }
  0xc5   : > { %v1298_v53 = vrot.slane %v1294_v33, 2  ;;  %v1299_v54 = vrot.slane %v1295_v34, 2 }
  0xc6   : > { %1140 = vrot.lane.b32.xlu1 %v2843_v21, %s3618_s4  ;;  %1127 = vrot.lane.b32.xlu0 %v2850_v23, %s3618_s4  ;;  %v1273_v23 = vrot.slane %v1269_v14, 2  ;;  %v1324_v14 = vrot.slane %v1320_v56, 2 }
  0xc8   : > { %v2931_v21 = vpop.permute.xlu1 %270  ;;  %v255_v32 = vpop.permute.xlu0 %254  ;;  %v1274_v52 = vsel %vm469_vm1, %v1272_v25, %v1273_v23  ;;  %v356_v25 = vsel %vm320_vm0, %v354_v1, %v355_v10  ;;  %v3001_v23 = vmul.f32 %v2979_v18, %v1398_v11  ;;  %v487_v10 = vstv %s2989_s24  ;;  %s3087_s24 = sld [smem:[#allocation2 + $0x68]] }
  0xc9   : > { %v273_v33 = vadd.f32 %v2931_v21, %v2845_v22 }
  0xca   : > { %1166 = vrot.lane.b32.xlu1 %v1165_v61, %s3618_s4  ;;  %1153 = vrot.lane.b32.xlu0 %v1152_v62, %s3618_s4  ;;  %v1358_v61 = vstv %s2929_s7  ;;  %s3033_s7 = sld [smem:[#allocation2 + $0x8b]] }
  0xcb   : > { %v2976_v17 = vmul.f32 %v2787_v45, %v1358_v61  ;;  %v1360_v28 = vmul.f32 %v2773_v41, %v1358_v61 }
  0xcc   : > { %v279_v44 = vpop.permute.xlu1 %278  ;;  %v263_v50 = vpop.permute.xlu0 %262 }
  0xcd   : > { %v265_v58 = vadd.f32 %v263_v50, %v241_v8  ;;  %v1345_v8 = vstv %s2940_s10  ;;  %v281_v19 = vadd.f32 %v279_v44, %v2904_v7  ;;  %v476_v7 = vstv %s2952_s1  ;;  %s3036_s10 = sld [smem:[#allocation2 + $0x65]]  ;;  %s3041_s1 = sld [smem:[#allocation2 + $0x9]] }
  0xce   : > { %1192 = vrot.lane.b32.xlu1 %v1191_v9, %s2332_s2  ;;  %1179 = vrot.lane.b32.xlu0 %v1178_v12, %s2332_s2  ;;  %v1338_v9 = vrot.slane %v1334_v55, 2  ;;  %v257_v12 = vadd.f32 %v255_v32, %v2852_v24  ;;  %v1300_v24 = vsel %vm469_vm1, %v1298_v53, %v1299_v54  ;;  %v2993_v29 = vmul.f32 %v2787_v45, %v1345_v8 }
  0xcf   : > { %v1347_v32 = vmul.f32 %v2773_v41, %v1345_v8  ;;  %v1326_v45 = vsel %vm469_vm1, %v1324_v14, %v1325_v15  ;;  %v1363_v34 = vrot.slane %v2976_v17, 2  ;;  %v1390_v41 = vstv %s2963_s9  ;;  %v3055_v15 = vld [vmem:[%s2473_s25 + $0x38] sm:$0x3]  ;;  %s3064_s9 = sld [smem:[#allocation2 + $0x44]] }
  0xd0   : > { %v295_v62 = vpop.permute.xlu1 %294  ;;  %v287_v6 = vpop.permute.xlu0 %286  ;;  %v1339_v31 = vsel %vm469_vm1, %v1337_v4, %v1338_v9  ;;  %v477_v37 = vmul.f32 %v2187_v36, %v476_v7  ;;  %v478_v39 = vmul.f32 %v2188_v38, %v476_v7  ;;  %v1364_v40 = vrot.slane %v1360_v28, 2 }
  0xd1   : > { %v297_v5 = vadd.f32 %v295_v62, %v265_v58  ;;  %v289_v26 = vadd.f32 %v287_v6, %v257_v12  ;;  %v1350_v42 = vrot.slane %v2993_v29, 2  ;;  %v1351_v50 = vrot.slane %v1347_v32, 2 }
  0xd2   : > { %1218 = vrot.lane.b32.xlu1 %v2910_v13, %s2332_s2  ;;  %1205 = vrot.lane.b32.xlu0 %v2917_v16, %s2332_s2  ;;  %v345_v13 = vsel %vm320_vm0, %v343_v59, %v344_v60  ;;  %v1414_v53 = vstv %s2981_s23  ;;  %v481_v55 = vrot.slane %v477_v37, 2  ;;  %v482_v1 = vrot.slane %v478_v39, 2  ;;  %s3083_s23 = sld [smem:[#allocation2 + $0x8c]] }
  0xd3   : > { %v336_v0 = vadd.f32 %v334_v63, %v297_v5  ;;  %v325_v21 = vadd.f32 %v323_v2, %v289_v26  ;;  %v1406_v58 = vstv %s2996_s28  ;;  %v499_v59 = vmul.f32 %v2187_v36, %v498_v48  ;;  %s3089_s28 = sld [smem:[#allocation2 + $0x46]] }
  0xd4   : > { %v311_v27 = vpop.permute.xlu1 %310  ;;  %v303_v30 = vpop.permute.xlu0 %302  ;;  %v500_v60 = vmul.f32 %v2188_v38, %v498_v48  ;;  %v1365_v63 = vsel %vm469_vm1, %v1363_v34, %v1364_v40  ;;  %v470_v2 = vrot.slane %v465_v46, 2  ;;  %v1352_v5 = vsel %vm469_vm1, %v1350_v42, %v1351_v50 }
  0xd5   : > { %v313_v16 = vadd.f32 %v311_v27, %v281_v19  ;;  %v305_v22 = vadd.f32 %v303_v30, %v273_v33  ;;  %v488_v6 = vmul.f32 %v2187_v36, %v487_v10  ;;  %v1511_v9 = vstv %s3010_s30  ;;  %s3099_s30 = sld [smem:[#allocation2 + $0x75]] }
  0xd6   : > { %1288 = vrot.lane.b32.xlu1 %v2925_v20, %s3618_s4  ;;  %1275 = vrot.lane.b32.xlu0 %v1274_v52, %s3618_s4  ;;  %v3026_v52 = vmul.f32 %v2979_v18, %v1390_v41  ;;  %v3048_v8 = vmul.f32 %v2979_v18, %v1414_v53  ;;  %v3051_v11 = vmul.f32 %v2979_v18, %v1406_v58  ;;  %v1430_v14 = vstv %s3016_s5  ;;  %s3106_s5 = sld [smem:[#allocation2 + $0x51]] }
  0xd7   : > { %v358_v54 = vadd.f32 %v356_v25, %v313_v16  ;;  %v347_v57 = vadd.f32 %v345_v13, %v305_v22  ;;  %v489_v12 = vmul.f32 %v2188_v38, %v487_v10  ;;  %v483_v19 = vsel %vm469_vm1, %v481_v55, %v482_v1 }
  0xd8   : > { %v382_v20 = vpop.permute.xlu1 %381  ;;  %v369_v44 = vpop.permute.xlu0 %368  ;;  %v504_v25 = vrot.slane %v500_v60, 2  ;;  %v1422_v13 = vstv %s3019_s29  ;;  %v1512_v29 = vmul.f32 %v2979_v18, %v1511_v9  ;;  %v1498_v7 = vstv %s3022_s6  ;;  %s3128_s29 = sld [smem:[#allocation2 + $0x22]]  ;;  %s3141_s6 = sld [smem:[#allocation2 + $0x30]] }
  0xd9   : > { %v384_v43 = vadd.f32 %v382_v20, %v336_v0  ;;  %v371_v49 = vadd.f32 %v369_v44, %v325_v21  ;;  %v492_v30 = vrot.slane %v488_v6, 2  ;;  %v1513_v32 = vmul.f32 %v3055_v15, %v1511_v9 }
  0xda   : > { %1314 = vrot.lane.b32.xlu1 %v1313_v3, %s3618_s4  ;;  %1301 = vrot.lane.b32.xlu0 %v1300_v24, %s3618_s4  ;;  %v471_v3 = vrot.slane %v466_v47, 2  ;;  %v503_v24 = vrot.slane %v499_v59, 2  ;;  %v493_v33 = vrot.slane %v489_v12, 2  ;;  %v1446_v34 = vstv %s3031_s11  ;;  %s3148_s11 = sld [smem:[#allocation2 + $0xc]] }
  0xdb   : > { %v1537_v35 = vstv %s3033_s7  ;;  %v1438_v36 = vstv %s3036_s10  ;;  %v1499_v37 = vmul.f32 %v2979_v18, %v1498_v7  ;;  %v1500_v38 = vmul.f32 %v3055_v15, %v1498_v7  ;;  %s3154_s7 = sld [smem:[#allocation2 + $0x8e]]  ;;  %s3156_s10 = sld [smem:[#allocation2 + $0x6a]] }
  0xdc   : > { %v408_v56 = vpop.permute.xlu1 %407  ;;  %v395_v62 = vpop.permute.xlu0 %394  ;;  %v472_v28 = vsel %vm469_vm1, %v470_v2, %v471_v3  ;;  %v505_v41 = vsel %vm469_vm1, %v503_v24, %v504_v25  ;;  %v1516_v20 = vrot.slane %v1512_v29, 1  ;;  %v620_v21 = vstv %s3039_s21  ;;  %s3166_s21 = sld [smem:[#allocation2 + $0x78]] }
  0xdd   : > { %v410_v61 = vadd.f32 %v408_v56, %v358_v54  ;;  %v397_v4 = vadd.f32 %v395_v62, %v347_v57  ;;  %v616_v40 = vstv %s3041_s1  ;;  %v3094_v44 = vmul.f32 %v2979_v18, %v1537_v35  ;;  %s3171_s1 = sld [smem:[#allocation2 + $0x54]] }
  0xde   : > { %1340 = vrot.lane.b32.xlu1 %v1339_v31, %s2332_s2  ;;  %1327 = vrot.lane.b32.xlu0 %v1326_v45, %s2332_s2  ;;  %v3068_v31 = vmul.f32 %v2979_v18, %v1430_v14  ;;  %v3073_v45 = vmul.f32 %v2979_v18, %v1422_v13  ;;  %v3097_v46 = vmul.f32 %v3055_v15, %v1537_v35  ;;  %v1503_v54 = vrot.slane %v1499_v37, 1 }
  0xdf   : > { %v494_v48 = vsel %vm469_vm1, %v492_v30, %v493_v33  ;;  %v1504_v55 = vrot.slane %v1500_v38, 1  ;;  %v1524_v1 = vstv %s3059_s20  ;;  %v3110_v57 = vmul.f32 %v2607_v51, %v620_v21  ;;  %s3178_s20 = sld [smem:[#allocation2 + $0x47]] }
  0xe0   : > { %v434_v17 = vpop.permute.xlu1 %433  ;;  %v421_v27 = vpop.permute.xlu0 %420  ;;  %v1563_v58 = vstv %s3064_s9  ;;  %v1543_v62 = vrot.slane %v3097_v46, 1  ;;  %v1526_v2 = vmul.f32 %v3055_v15, %v1524_v1  ;;  %v1550_v3 = vstv %s3077_s0  ;;  %s3197_s9 = sld [smem:[#allocation2 + $0x23]]  ;;  %s3205_s0 = sld [smem:[#allocation2 + $0x8f]] }
  0xe1   : > { %v436_v26 = vadd.f32 %v434_v17, %v384_v43  ;;  %v423_v16 = vadd.f32 %v421_v27, %v371_v49  ;;  %v1517_v43 = vrot.slane %v1513_v32, 1  ;;  %v1447_v49 = vmul.f32 %v2979_v18, %v1446_v34 }
  0xe2   : > { %1366 = vrot.lane.b32.xlu1 %v1365_v63, %s2332_s2  ;;  %1353 = vrot.lane.b32.xlu0 %v1352_v5, %s2332_s2  ;;  %v1525_v63 = vmul.f32 %v2979_v18, %v1524_v1  ;;  %v1505_v6 = vsel %vm320_vm0, %v1503_v54, %v1504_v55  ;;  %v1564_v9 = vmul.f32 %v2979_v18, %v1563_v58  ;;  %v1576_v17 = vstv %s3087_s24  ;;  %s3220_s24 = sld [smem:[#allocation2 + $0x33]] }
  0xe3   : > { %v485_v47 = vadd.f32 %v483_v19, %v436_v26  ;;  %v474_v53 = vadd.f32 %v472_v28, %v423_v16  ;;  %v3119_v60 = vsel %vm320_vm0, %v1516_v20, %v1517_v43  ;;  %v1659_v19 = vstv %s3089_s28  ;;  %s3225_s28 = sld [smem:[#allocation2 + $0xf]] }
  0xe4   : > { %v460_v0 = vpop.permute.xlu1 %459  ;;  %v447_v22 = vpop.permute.xlu0 %446  ;;  %v628_v25 = vstv %s3099_s30  ;;  %v1551_v13 = vmul.f32 %v2979_v18, %v1550_v3  ;;  %v1552_v26 = vmul.f32 %v3055_v15, %v1550_v3  ;;  %v1529_v27 = vrot.slane %v1525_v63, 1  ;;  %s3238_s30 = sld [smem:[#allocation2 + $0x7b]] }
  0xe5   : > { %v462_v39 = vadd.f32 %v460_v0, %v410_v61  ;;  %v449_v42 = vadd.f32 %v447_v22, %v397_v4  ;;  %v1542_v61 = vrot.slane %v3094_v44, 1  ;;  %v624_v28 = vstv %s3106_s5  ;;  %v3162_v22 = vld [vmem:[%s2473_s25 + $0x10] sm:$0xff]  ;;  %s3244_s5 = sld [smem:[#allocation2 + $0x57]] }
  0xe6   : > { %1401 = vrot.lane.b32.xlu1 %v3001_v23, %s3618_s4  ;;  %1393 = vrot.lane.b32.xlu0 %v3026_v52, %s3618_s4  ;;  %v1439_v23 = vmul.f32 %v2979_v18, %v1438_v36  ;;  %v3113_v52 = vmul.f32 %v2607_v51, %v616_v40  ;;  %v1577_v30 = vmul.f32 %v2979_v18, %v1576_v17  ;;  %v1530_v35 = vrot.slane %v1526_v2, 1 }
  0xe7   : > { %v507_v51 = vadd.f32 %v505_v41, %v462_v39  ;;  %v496_v5 = vadd.f32 %v494_v48, %v449_v42  ;;  %v1660_v32 = vmul.f32 %v2979_v18, %v1659_v19  ;;  %v1661_v33 = vmul.f32 %v3055_v15, %v1659_v19 }
  0xe8   : > { %v531_v50 = vpop.permute.xlu1 %530  ;;  %v518_v56 = vpop.permute.xlu0 %517  ;;  %v1568_v0 = vrot.slane %v1564_v9, 1  ;;  %v1544_v37 = vsel %vm320_vm0, %v1542_v61, %v1543_v62  ;;  %v1555_v38 = vrot.slane %v1551_v13, 1  ;;  %v1556_v39 = vrot.slane %v1552_v26, 1  ;;  %v3193_v9 = vld [vmem:[%s2473_s25 + $0x18] sm:$0x3] }
  0xe9   : > { %v533_v10 = vadd.f32 %v531_v50, %v485_v47  ;;  %v520_v59 = vadd.f32 %v518_v56, %v474_v53  ;;  %v629_v20 = vmul.f32 %v3162_v22, %v628_v25  ;;  %v1646_v42 = vstv %s3128_s29  ;;  %s2006_s29 = sld [smem:[#allocation2 + $0x36]] }
  0xea   : > { %1417 = vrot.lane.b32.xlu1 %v3048_v8, %s3618_s4  ;;  %1409 = vrot.lane.b32.xlu0 %v3051_v11, %s3618_s4  ;;  %v1589_v8 = vstv %s3083_s23  ;;  %v1565_v11 = vmul.f32 %v3055_v15, %v1563_v58  ;;  %v1581_v44 = vrot.slane %v1577_v30, 1  ;;  %v1664_v47 = vrot.slane %v1660_v32, 2  ;;  %s3210_s23 = sld [smem:[#allocation2 + $0x6b]] }
  0xeb   : > { %v1590_v29 = vmul.f32 %v2979_v18, %v1589_v8  ;;  %v1591_v7 = vmul.f32 %v3055_v15, %v1589_v8  ;;  %v1665_v48 = vrot.slane %v1661_v33, 2  ;;  %v625_v53 = vmul.f32 %v3162_v22, %v624_v28 }
  0xec   : > { %v557_v4 = vpop.permute.xlu1 %556  ;;  %v544_v14 = vpop.permute.xlu0 %543  ;;  %v1569_v41 = vrot.slane %v1565_v11, 1  ;;  %v1557_v1 = vsel %vm320_vm0, %v1555_v38, %v1556_v39  ;;  %v707_v56 = vstv %s3141_s6  ;;  %v1648_v61 = vmul.f32 %v3055_v15, %v1646_v42  ;;  %s2005_s6 = sld [smem:[#allocation2 + $0x12]] }
  0xed   : > { %v559_v12 = vadd.f32 %v557_v4, %v507_v51  ;;  %v546_v24 = vadd.f32 %v544_v14, %v496_v5  ;;  %v1594_v21 = vrot.slane %v1590_v29, 1  ;;  %v1595_v40 = vrot.slane %v1591_v7, 1 }
  0xee   : > { %1433 = vrot.lane.b32.xlu1 %v3068_v31, %s2332_s2  ;;  %1425 = vrot.lane.b32.xlu0 %v3073_v45, %s2332_s2  ;;  %v1578_v31 = vmul.f32 %v3055_v15, %v1576_v17  ;;  %v1570_v54 = vsel %vm320_vm0, %v1568_v0, %v1569_v41  ;;  %v696_v62 = vstv %s3148_s11  ;;  %v3188_v2 = vsel %vm469_vm1, %v1664_v47, %v1665_v48  ;;  %s3323_s11 = sld [smem:[#allocation2 + $0x7e]] }
  0xef   : > { %v1685_v3 = vstv %s3154_s7  ;;  %v1672_v8 = vstv %s3156_s10  ;;  %v697_v14 = vmul.f32 %v3162_v22, %v696_v62  ;;  %v698_v11 = vmul.f32 %v3193_v9, %v696_v62  ;;  %s3325_s7 = sld [smem:[#allocation2 + $0x81]]  ;;  %s3331_s10 = sld [smem:[#allocation2 + $0x5a]] }
  0xf0   : > { %v583_v16 = vpop.permute.xlu1 %582  ;;  %v570_v34 = vpop.permute.xlu0 %569  ;;  %v1582_v46 = vrot.slane %v1578_v31, 1  ;;  %v1652_v19 = vrot.slane %v1648_v61, 2  ;;  %v1687_v25 = vmul.f32 %v3055_v15, %v1685_v3  ;;  %v1674_v28 = vmul.f32 %v3055_v15, %v1672_v8 }
  0xf1   : > { %v585_v45 = vadd.f32 %v583_v16, %v533_v10  ;;  %v572_v36 = vadd.f32 %v570_v34, %v520_v59  ;;  %v1647_v10 = vmul.f32 %v2979_v18, %v1646_v42  ;;  %v1596_v59 = vsel %vm320_vm0, %v1594_v21, %v1595_v40 }
  0xf2   : > { %1449 = vrot.lane.b32.xlu1 %v1447_v49, %s2332_s2  ;;  %1441 = vrot.lane.b32.xlu0 %v1439_v23, %s2332_s2  ;;  %v1531_v23 = vsel %vm320_vm0, %v1529_v27, %v1530_v35  ;;  %v1583_v63 = vsel %vm320_vm0, %v1581_v44, %v1582_v46  ;;  %v1673_v27 = vmul.f32 %v2979_v18, %v1672_v8  ;;  %v729_v29 = vstv %s3166_s21  ;;  %s3333_s21 = sld [smem:[#allocation2 + $0x5d]] }
  0xf3   : > { %v622_v58 = vadd.f32 %v3110_v57, %v585_v45  ;;  %v709_v57 = vmul.f32 %v3193_v9, %v707_v56  ;;  %v718_v32 = vstv %s3171_s1  ;;  %v701_v45 = vrot.slane %v697_v14, 1  ;;  %s3337_s1 = sld [smem:[#allocation2 + $0x3c]] }
  0xf4   : > { %v609_v43 = vpop.permute.xlu1 %608  ;;  %v596_v50 = vpop.permute.xlu0 %595  ;;  %v702_v34 = vrot.slane %v698_v11, 1  ;;  %v1711_v35 = vstv %s3178_s20  ;;  %v1691_v41 = vrot.slane %v1687_v25, 2  ;;  %v1678_v21 = vrot.slane %v1674_v28, 2  ;;  %s3343_s20 = sld [smem:[#allocation2 + $0x18]] }
  0xf5   : > { %v611_v49 = vadd.f32 %v609_v43, %v559_v12  ;;  %v598_v55 = vadd.f32 %v596_v50, %v546_v24  ;;  %v1686_v24 = vmul.f32 %v2979_v18, %v1685_v3  ;;  %v713_v31 = vrot.slane %v709_v57, 1 }
  0xf6   : > { %1519 = vrot.lane.b32.xlu1 %v3119_v60, %s3618_s4  ;;  %1506 = vrot.lane.b32.xlu0 %v1505_v6, %s3618_s4  ;;  %v618_v60 = vadd.f32 %v3113_v52, %v572_v36  ;;  %v708_v6 = vmul.f32 %v3162_v22, %v707_v56  ;;  %v1651_v52 = vrot.slane %v1647_v10, 2  ;;  %v730_v36 = vmul.f32 %v3162_v22, %v729_v29 }
  0xf7   : > { %v630_v17 = vadd.f32 %v629_v20, %v611_v49  ;;  %v626_v26 = vadd.f32 %v625_v53, %v598_v55  ;;  %v1690_v0 = vrot.slane %v1686_v24, 2  ;;  %v1677_v20 = vrot.slane %v1673_v27, 2 }
  0xf8   : > { %v644_v51 = vpop.permute.xlu1 %643  ;;  %v636_v5 = vpop.permute.xlu0 %635  ;;  %v712_v30 = vrot.slane %v708_v6, 1  ;;  %v1653_v39 = vsel %vm469_vm1, %v1651_v52, %v1652_v19  ;;  %v719_v40 = vmul.f32 %v3162_v22, %v718_v32  ;;  %v720_v44 = vmul.f32 %v3193_v9, %v718_v32 }
  0xf9   : > { %v646_v4 = vadd.f32 %v644_v51, %v622_v58  ;;  %v638_v12 = vadd.f32 %v636_v5, %v618_v60  ;;  %v1712_v46 = vmul.f32 %v2979_v18, %v1711_v35  ;;  %v1698_v47 = vstv %s3197_s9  ;;  %s3358_s9 = sld [smem:[#allocation2 + $0x84]] }
  0xfa   : > { %1545 = vrot.lane.b32.xlu1 %v1544_v37, %s3618_s4  ;;  %1532 = vrot.lane.b32.xlu0 %v1531_v23, %s3618_s4  ;;  %v731_v37 = vmul.f32 %v3193_v9, %v729_v29  ;;  %v714_v49 = vsel %vm320_vm0, %v712_v30, %v713_v31  ;;  %v703_v50 = vsel %vm320_vm0, %v701_v45, %v702_v34  ;;  %v1724_v61 = vstv %s3210_s23  ;;  %s3392_s23 = sld [smem:[#allocation2 + $0x3f]] }
  0xfb   : > { %v1713_v23 = vmul.f32 %v3055_v15, %v1711_v35  ;;  %v1692_v53 = vsel %vm469_vm1, %v1690_v0, %v1691_v41  ;;  %v1679_v56 = vsel %vm469_vm1, %v1677_v20, %v1678_v21  ;;  %v1699_v58 = vmul.f32 %v2979_v18, %v1698_v47 }
  0xfc   : > { %v660_v13 = vpop.permute.xlu1 %659  ;;  %v652_v16 = vpop.permute.xlu0 %651  ;;  %v735_v55 = vrot.slane %v731_v37, 1  ;;  %v723_v60 = vrot.slane %v719_v40, 1  ;;  %v724_v3 = vrot.slane %v720_v44, 1  ;;  %v1725_v52 = vmul.f32 %v2979_v18, %v1724_v61 }
  0xfd   : > { %v662_v7 = vadd.f32 %v660_v13, %v630_v17  ;;  %v654_v33 = vadd.f32 %v652_v16, %v626_v26  ;;  %v1717_v5 = vrot.slane %v1713_v23, 2  ;;  %v1726_v14 = vmul.f32 %v3055_v15, %v1724_v61 }
  0xfe   : > { %1571 = vrot.lane.b32.xlu1 %v1570_v54, %s2332_s2  ;;  %1558 = vrot.lane.b32.xlu0 %v1557_v1, %s2332_s2  ;;  %v734_v54 = vrot.slane %v730_v36, 1  ;;  %v1737_v1 = vstv %s3205_s0  ;;  %v855_v24 = vstv %s3220_s24  ;;  %v725_v26 = vsel %vm320_vm0, %v723_v60, %v724_v3  ;;  %s3368_s0 = sld [smem:[#allocation2 + $0x60]]  ;;  %s3401_s24 = sld [smem:[#allocation2 + $0x1b]] }
  0xff   : > { %v1738_v6 = vmul.f32 %v2979_v18, %v1737_v1  ;;  %v1739_v57 = vmul.f32 %v3055_v15, %v1737_v1  ;;  %v844_v27 = vstv %s3225_s28  ;;  %v1729_v30 = vrot.slane %v1725_v52, 2  ;;  %v2079_v1 = vld [vmem:[%s2473_s25 + $0x11] sm:$0xff]  ;;  %s3406_s28 = sld [smem:[#allocation2 + $0x87]] }
 0x100   : > { %v676_v38 = vpop.permute.xlu1 %675  ;;  %v668_v43 = vpop.permute.xlu0 %667  ;;  %v1730_v31 = vrot.slane %v1726_v14, 2  ;;  %v856_v32 = vmul.f32 %v3162_v22, %v855_v24  ;;  %v857_v35 = vmul.f32 %v3193_v9, %v855_v24  ;;  %v845_v0 = vmul.f32 %v3162_v22, %v844_v27 }
 0x101   : > { %v678_v42 = vadd.f32 %v676_v38, %v646_v4  ;;  %v670_v48 = vadd.f32 %v668_v43, %v638_v12  ;;  %v1716_v4 = vrot.slane %v1712_v46, 2  ;;  %v736_v12 = vsel %vm320_vm0, %v734_v54, %v735_v55 }
 0x102   : > { %1597 = vrot.lane.b32.xlu1 %v1596_v59, %s2332_s2  ;;  %1584 = vrot.lane.b32.xlu0 %v1583_v63, %s2332_s2  ;;  %v1700_v59 = vmul.f32 %v3055_v15, %v1698_v47  ;;  %v1743_v18 = vrot.slane %v1739_v57, 2  ;;  %v846_v37 = vmul.f32 %v3193_v9, %v844_v27  ;;  %v877_v38 = vstv %s3238_s30  ;;  %v2081_v57 = vld [vmem:[%s2473_s25 + $0x21] sm:$0xff]  ;;  %s3414_s30 = sld [smem:[#allocation2 + $0x42]] }
 0x103   : > { %v716_v8 = vadd.f32 %v714_v49, %v678_v42  ;;  %v705_v17 = vadd.f32 %v703_v50, %v670_v48  ;;  %v1718_v29 = vsel %vm469_vm1, %v1716_v4, %v1717_v5  ;;  %v866_v20 = vstv %s3244_s5  ;;  %s3417_s5 = sld [smem:[#allocation2 + $0x1e]] }
 0x104   : > { %v692_v10 = vpop.permute.xlu1 %691  ;;  %v684_v51 = vpop.permute.xlu0 %683  ;;  %v1704_v19 = vrot.slane %v1700_v59, 2  ;;  %v1731_v40 = vsel %vm469_vm1, %v1729_v30, %v1730_v31  ;;  %v860_v42 = vrot.slane %v856_v32, 2  ;;  %v861_v44 = vrot.slane %v857_v35, 2 }
 0x105   : > { %v694_v62 = vadd.f32 %v692_v10, %v662_v7  ;;  %v686_v63 = vadd.f32 %v684_v51, %v654_v33  ;;  %v1742_v7 = vrot.slane %v1738_v6, 2  ;;  %v849_v46 = vrot.slane %v845_v0, 2 }
 0x106   : > { %1667 = vrot.lane.b32.xlu1 %v3188_v2, %s3618_s4  ;;  %1654 = vrot.lane.b32.xlu0 %v1653_v39, %s3618_s4  ;;  %v1703_v2 = vrot.slane %v1699_v58, 2  ;;  %v878_v47 = vmul.f32 %v3162_v22, %v877_v38  ;;  %v879_v48 = vmul.f32 %v3193_v9, %v877_v38  ;;  %v850_v23 = vrot.slane %v846_v37, 2 }
 0x107   : > { %v738_v16 = vadd.f32 %v736_v12, %v694_v62  ;;  %v727_v45 = vadd.f32 %v725_v26, %v686_v63  ;;  %v1744_v21 = vsel %vm469_vm1, %v1742_v7, %v1743_v18  ;;  %v868_v54 = vmul.f32 %v3193_v9, %v866_v20  ;;  %v2083_v63 = vld [vmem:[%s2473_s25 + $0x31] sm:$0xff] }
 0x108   : > { %v762_v11 = vpop.permute.xlu1 %761  ;;  %v749_v13 = vpop.permute.xlu0 %748  ;;  %v1705_v34 = vsel %vm469_vm1, %v1703_v2, %v1704_v19  ;;  %v862_v58 = vsel %vm469_vm1, %v860_v42, %v861_v44  ;;  %v882_v59 = vrot.slane %v878_v47, 2  ;;  %v883_v61 = vrot.slane %v879_v48, 2 }
 0x109   : > { %v764_v25 = vadd.f32 %v762_v11, %v716_v8  ;;  %v751_v28 = vadd.f32 %v749_v13, %v705_v17  ;;  %v872_v9 = vrot.slane %v868_v54, 2  ;;  %v995_v47 = vstv %s2005_s6  ;;  %s3441_s6 = sld [smem:[#allocation2 + $0x45]] }
 0x10a   : > { %1693 = vrot.lane.b32.xlu1 %v1692_v53, %s3618_s4  ;;  %1680 = vrot.lane.b32.xlu0 %v1679_v56, %s3618_s4  ;;  %v867_v53 = vmul.f32 %v3162_v22, %v866_v20  ;;  %v1752_v56 = vld [vmem:[%s2473_s25 + $0x1] sm:$0xff]  ;;  %v851_v22 = vsel %vm469_vm1, %v849_v46, %v850_v23  ;;  %v884_v8 = vsel %vm469_vm1, %v882_v59, %v883_v61  ;;  %v999_v46 = vstv %s2006_s29  ;;  %s3434_s29 = sld [smem:[#allocation2 + $0x66]] }
 0x10b   : > { %v1007_v48 = vstv %s3323_s11  ;;  %s3459_s11 = sld [smem:[#allocation2 + $0x21]] }
 0x10c   : > { %v788_v33 = vpop.permute.xlu1 %787  ;;  %v775_v36 = vpop.permute.xlu0 %774  ;;  %v871_v60 = vrot.slane %v867_v53, 2  ;;  %v3350_v53 = vld [vmem:[%s2473_s25 + $0x28] sm:$0x3] }
 0x10d   : > { %v790_v41 = vadd.f32 %v788_v33, %v738_v16  ;;  %v777_v39 = vadd.f32 %v775_v36, %v727_v45 }
 0x10e   : > { %1719 = vrot.lane.b32.xlu1 %v1718_v29, %s2332_s2  ;;  %1706 = vrot.lane.b32.xlu0 %v1705_v34, %s2332_s2  ;;  %v873_v14 = vsel %vm469_vm1, %v871_v60, %v872_v9 }
 0x110   : > { %v814_v43 = vpop.permute.xlu1 %813  ;;  %v801_v50 = vpop.permute.xlu0 %800 }
 0x111   : > { %v816_v49 = vadd.f32 %v814_v43, %v764_v25  ;;  %v803_v55 = vadd.f32 %v801_v50, %v751_v28  ;;  %v3346_v50 = vld [vmem:[%s2473_s25 + $0x20] sm:$0xff] }
 0x112   : > { %1745 = vrot.lane.b32.xlu1 %v1744_v21, %s2332_s2  ;;  %1732 = vrot.lane.b32.xlu0 %v1731_v40, %s2332_s2  ;;  %s2018_s2 = sld [smem:[#allocation2 + $0x39]]  ;;  %v1008_v60 = vmul.f32 %v3346_v50, %v1007_v48 }
 0x113   : > { %v864_v4 = vadd.f32 %v862_v58, %v816_v49  ;;  %v853_v6 = vadd.f32 %v851_v22, %v803_v55  ;;  %v1108_v49 = vstv %s3325_s7  ;;  %v1000_v58 = vmul.f32 %v3346_v50, %v999_v46  ;;  %s3483_s7 = sld [smem:[#allocation2 + $0x8d]] }
 0x114   : > { %v840_v10 = vpop.permute.xlu1 %839  ;;  %v827_v51 = vpop.permute.xlu0 %826  ;;  %v1109_v22 = vmul.f32 %v3346_v50, %v1108_v49  ;;  %v1110_v9 = vmul.f32 %v3350_v53, %v1108_v49 }
 0x115   : > { %v842_v62 = vadd.f32 %v840_v10, %v790_v41  ;;  %v829_v3 = vadd.f32 %v827_v51, %v777_v39  ;;  %v1003_v51 = vstv %s3331_s10  ;;  %s3490_s10 = sld [smem:[#allocation2 + $0x69]] }
 0x116   : > { %1765 = vrot.lane.b32.xlu1 %v2079_v1, %s3618_s4  ;;  %1754 = vrot.lane.b32.xlu0 %v1752_v56, %s3618_s4 }
 0x117   : > { %v886_v17 = vadd.f32 %v884_v8, %v842_v62  ;;  %v875_v19 = vadd.f32 %v873_v14, %v829_v3  ;;  %v996_v62 = vmul.f32 %v3346_v50, %v995_v47  ;;  %v1097_v3 = vstv %s3333_s21  ;;  %s2086_s21 = sshll.u32 %s2315_s16, 3 }
 0x118   : > { %v910_v5 = vpop.permute.xlu1 %909  ;;  %v897_v52 = vpop.permute.xlu0 %896  ;;  %v1086_v42 = vstv %s2018_s2  ;;  %v1234_v14 = vstv %s3337_s1  ;;  %s3423_s2 = sld [smem:[#allocation2 + $0x63]] }
 0x119   : > { %v912_v12 = vadd.f32 %v910_v5, %v864_v4  ;;  %v899_v11 = vadd.f32 %v897_v52, %v853_v6  ;;  %v1087_v23 = vmul.f32 %v3346_v50, %v1086_v42  ;;  %v1088_v54 = vmul.f32 %v3350_v53, %v1086_v42 }
 0x11a   : > { %1787 = vrot.lane.b32.xlu1 %v2083_v63, %s3618_s4  ;;  %1776 = vrot.lane.b32.xlu0 %v2081_v57, %s3618_s4  ;;  %s2017_s4 = sld [smem:[#allocation2 + $0x15]]  ;;  %v1004_v52 = vmul.f32 %v3346_v50, %v1003_v51  ;;  %v1099_v42 = vmul.f32 %v3350_v53, %v1097_v3  ;;  %v1235_v47 = vmul.f32 %v3346_v50, %v1234_v14 }
 0x11b   : > { %v1091_v4 = vrot.slane %v1087_v23, 1  ;;  %v1092_v63 = vrot.slane %v1088_v54, 1  ;;  %v1236_v49 = vmul.f32 %v3350_v53, %v1234_v14 }
 0x11c   : > { %v936_v2 = vpop.permute.xlu1 %935  ;;  %v923_v25 = vpop.permute.xlu0 %922  ;;  %v1239_v51 = vrot.slane %v1235_v47, 2  ;;  %v3445_v47 = vld [vmem:[%s2473_s25 + $0x30] sm:$0xff] }
 0x11d   : > { %v3285_v24 = vadd.f32 %v936_v2, %v886_v17  ;;  %v3287_v13 = vadd.f32 %v923_v25, %v875_v19  ;;  %v1113_v19 = vrot.slane %v1109_v22, 1  ;;  %v1098_v25 = vmul.f32 %v3346_v50, %v1097_v3 }
 0x120   : > { %v962_v26 = vpop.permute.xlu1 %961  ;;  %v949_v27 = vpop.permute.xlu0 %948  ;;  %v1075_v43 = vstv %s2017_s4  ;;  %s3428_s4 = sld [smem:[#allocation2 + $0x8a]] }
 0x121   : > { %v1076_v55 = vmul.f32 %v3346_v50, %v1075_v43  ;;  %v1077_v1 = vmul.f32 %v3350_v53, %v1075_v43  ;;  %v964_v56 = vadd.f32 %v962_v26, %v912_v12  ;;  %v951_v61 = vadd.f32 %v949_v27, %v899_v11 }
 0x122   : > { %v1114_v27 = vrot.slane %v1110_v9, 1  ;;  %v1093_v43 = vsel %vm320_vm0, %v1091_v4, %v1092_v63 }
 0x123   : > { %v1080_v5 = vrot.slane %v1076_v55, 1  ;;  %v1081_v6 = vrot.slane %v1077_v1, 1  ;;  %v1001_v12 = vadd.f32 %v1000_v58, %v964_v56  ;;  %v997_v2 = vadd.f32 %v996_v62, %v951_v61 }
 0x124   : > { %v988_v28 = vpop.permute.xlu1 %987  ;;  %v3289_v29 = vpop.permute.xlu0 %974  ;;  %v1115_v58 = vsel %vm320_vm0, %v1113_v19, %v1114_v27  ;;  %v1103_v61 = vrot.slane %v1099_v42, 1 }
 0x125   : > { %v990_v8 = vadd.f32 %v988_v28, %v3285_v24  ;;  %v977_v17 = vadd.f32 %v3289_v29, %v3287_v13  ;;  %v1223_v24 = vstv %s3343_s20  ;;  %v1082_v46 = vsel %vm320_vm0, %v1080_v5, %v1081_v6  ;;  %s1805_s20 = sadd.s32 %s2311_s15, %s2086_s21 }
 0x126   : > { %v1224_v55 = vmul.f32 %v3346_v50, %v1223_v24  ;;  %v1225_v1 = vmul.f32 %v3350_v53, %v1223_v24  ;;  %s2087_s16 = sshll.u32 %s1805_s20, 7 }
 0x127   : > { %v1009_v29 = vadd.f32 %v1008_v60, %v990_v8  ;;  %v1245_v60 = vstv %s3368_s0 }
 0x128   : > { %v3291_v7 = vpop.permute.xlu1 %1022  ;;  %v3293_v18 = vpop.permute.xlu0 %1014  ;;  %v1228_v6 = vrot.slane %v1224_v55, 2  ;;  %v1229_v8 = vrot.slane %v1225_v1, 2  ;;  %v1247_v14 = vmul.f32 %v3350_v53, %v1245_v60 }
 0x129   : > { %v1025_v26 = vadd.f32 %v3291_v7, %v1001_v12  ;;  %v1017_v28 = vadd.f32 %v3293_v18, %v997_v2  ;;  %v1256_v7 = vstv %s3358_s9  ;;  %v1005_v18 = vadd.f32 %v1004_v52, %v977_v17 }
 0x12a   : > { %v1257_v22 = vmul.f32 %v3346_v50, %v1256_v7  ;;  %v1258_v4 = vmul.f32 %v3350_v53, %v1256_v7  ;;  %v1246_v52 = vmul.f32 %v3346_v50, %v1245_v60  ;;  %v1230_v42 = vsel %vm469_vm1, %v1228_v6, %v1229_v8 }
 0x12b   : > { %v1487_v60 = vstv %s3428_s4 }
 0x12c   : > { %v3295_v16 = vpop.permute.xlu1 %1038  ;;  %v3297_v30 = vpop.permute.xlu0 %1030  ;;  %v1261_v2 = vrot.slane %v1257_v22, 2 }
 0x12d   : > { %v1041_v56 = vadd.f32 %v3295_v16, %v1009_v29  ;;  %v1033_v62 = vadd.f32 %v3297_v30, %v1005_v18  ;;  %v1240_v16 = vrot.slane %v1236_v49, 2 }
 0x12f   : > { %v1241_v27 = vsel %vm469_vm1, %v1239_v51, %v1240_v16 }
 0x130   : > { %v3299_v31 = vpop.permute.xlu1 %1054  ;;  %v3301_v32 = vpop.permute.xlu0 %1046 }
 0x131   : > { %v1057_v48 = vadd.f32 %v3299_v31, %v1025_v26  ;;  %v1049_v54 = vadd.f32 %v3301_v32, %v1017_v28  ;;  %v1102_v31 = vrot.slane %v1098_v25, 1  ;;  %v1262_v25 = vrot.slane %v1258_v4, 2 }
 0x132   : > { %v1378_v26 = vstv %s3392_s23  ;;  %v1250_v28 = vrot.slane %v1246_v52, 2  ;;  %v1476_v4 = vstv %s3434_s29  ;;  %v1613_v52 = vstv %s3441_s6 }
 0x133   : > { %v1095_v3 = vadd.f32 %v1093_v43, %v1057_v48  ;;  %v1084_v5 = vadd.f32 %v1082_v46, %v1049_v54  ;;  %v1251_v43 = vrot.slane %v1247_v14, 2  ;;  %v1379_v29 = vmul.f32 %v3445_v47, %v1378_v26 }
 0x134   : > { %v3303_v33 = vpop.permute.xlu1 %1070  ;;  %v3305_v45 = vpop.permute.xlu0 %1062  ;;  %v1465_v54 = vstv %s3414_s30 }
 0x135   : > { %v1073_v9 = vadd.f32 %v3303_v33, %v1041_v56  ;;  %v1065_v30 = vadd.f32 %v3305_v45, %v1033_v62  ;;  %v1104_v33 = vsel %vm320_vm0, %v1102_v31, %v1103_v61  ;;  %v1454_v56 = vstv %s3417_s5  ;;  %s2333_s5 = smov [#allocation7]  }
 0x136   : > { %v1382_v61 = vstv %s3423_s2  ;;  %v1466_v51 = vmul.f32 %v3445_v47, %v1465_v54  ;;  %v1456_v6 = vmul.f32 %v3055_v15, %v1454_v56  ;;  %s2229_s2 = sshll.u32 %s2333_s5, 4  ;;  %s2230_s2 = int_to_ptr.vmem [resolvable:$false] %s2229_s2 }
 0x137   : > { %v1117_v19 = vadd.f32 %v1115_v58, %v1073_v9  ;;  %v1106_v53 = vadd.f32 %v1104_v33, %v1065_v30  ;;  %v1489_v33 = vmul.f32 %v3055_v15, %v1487_v60  ;;  %s2231_s4 = scalar_lea.vmem %s2230_s2, 1024 }
 0x138   : > { %v3307_v34 = vpop.permute.xlu1 %1140  ;;  %v3309_v35 = vpop.permute.xlu0 %1127  ;;  %v1470_v14 = vrot.slane %v1466_v51, 1 }
 0x139   : > { %v1143_v12 = vadd.f32 %v3307_v34, %v1095_v3  ;;  %v1130_v17 = vadd.f32 %v3309_v35, %v1084_v5 }
 0x13c   : > { %v3311_v0 = vpop.permute.xlu1 %1166  ;;  %v3313_v41 = vpop.permute.xlu0 %1153 }
 0x13d   : > { %v1169_v24 = vadd.f32 %v3311_v0, %v1117_v19  ;;  %v1156_v46 = vadd.f32 %v3313_v41, %v1106_v53  ;;  %v1263_v0 = vsel %vm469_vm1, %v1261_v2, %v1262_v25  ;;  %v1478_v2 = vmul.f32 %v3055_v15, %v1476_v4 }
 0x140   : > { %v3315_v36 = vpop.permute.xlu1 %1192  ;;  %v3317_v37 = vpop.permute.xlu0 %1179 }
 0x141   : > { %v1195_v34 = vadd.f32 %v3315_v36, %v1143_v12  ;;  %v1182_v35 = vadd.f32 %v3317_v37, %v1130_v17  ;;  %v1374_v36 = vstv %s3401_s24  ;;  %v1386_v37 = vstv %s3406_s28  ;;  %s3535_s24 = scalar_lea.hbm %s3596_s3, %s2087_s16 }
 0x142   : > { %v1375_v1 = vmul.f32 %v3445_v47, %v1374_v36  ;;  %v1387_v31 = vmul.f32 %v3445_v47, %v1386_v37  ;;  %v1488_v12 = vmul.f32 %v3445_v47, %v1487_v60 }
 0x143   : > { %v1243_v7 = vadd.f32 %v1241_v27, %v1195_v34  ;;  %v1232_v41 = vadd.f32 %v1230_v42, %v1182_v35  ;;  %v1460_v27 = vrot.slane %v1456_v6, 1 }
 0x144   : > { %v3319_v38 = vpop.permute.xlu1 %1218  ;;  %v3321_v39 = vpop.permute.xlu0 %1205 }
 0x145   : > { %v1221_v49 = vadd.f32 %v3319_v38, %v1169_v24  ;;  %v1208_v55 = vadd.f32 %v3321_v39, %v1156_v46  ;;  %v1252_v38 = vsel %vm469_vm1, %v1250_v28, %v1251_v43  ;;  %v1467_v39 = vmul.f32 %v3055_v15, %v1465_v54 }
 0x146   : > { %v1492_v24 = vrot.slane %v1488_v12, 1  ;;  %v1493_v28 = vrot.slane %v1489_v33, 1  ;;  %v1482_v46 = vrot.slane %v1478_v2, 1 }
 0x147   : > { %v1265_v9 = vadd.f32 %v1263_v0, %v1221_v49  ;;  %v1254_v30 = vadd.f32 %v1252_v38, %v1208_v55  ;;  %v1471_v34 = vrot.slane %v1467_v39, 1 }
 0x148   : > { %v3327_v20 = vpop.permute.xlu1 %1288  ;;  %v3329_v21 = vpop.permute.xlu0 %1275 }
 0x149   : > { %v1291_v58 = vadd.f32 %v3327_v20, %v1243_v7  ;;  %v1278_v62 = vadd.f32 %v3329_v21, %v1232_v41  ;;  %v1455_v20 = vmul.f32 %v3445_v47, %v1454_v56  ;;  %v1383_v21 = vmul.f32 %v3445_v47, %v1382_v61 }
 0x14a   : > { %v1615_v7 = vmul.f32 %v3055_v15, %v1613_v52  ;;  %v1635_v56 = vstv %s3483_s7 }
 0x14b   : > { %v1459_v25 = vrot.slane %v1455_v20, 1  ;;  %v1636_v20 = vmul.f32 %v3445_v47, %v1635_v56 }
 0x14c   : > { %v3335_v40 = vpop.permute.xlu1 %1314  ;;  %v3339_v44 = vpop.permute.xlu0 %1301  ;;  %v1619_v60 = vrot.slane %v1615_v7, 2 }
 0x14d   : > { %v1317_v8 = vadd.f32 %v3335_v40, %v1265_v9  ;;  %v1461_v55 = vsel %vm320_vm0, %v1459_v25, %v1460_v27 }
 0x150   : > { %v3355_v10 = vpop.permute.xlu1 %1340  ;;  %v3360_v59 = vpop.permute.xlu0 %1327 }
 0x151   : > { %v1343_v3 = vadd.f32 %v3355_v10, %v1291_v58  ;;  %v1330_v5 = vadd.f32 %v3360_v59, %v1278_v62  ;;  %v1304_v10 = vadd.f32 %v3339_v44, %v1254_v30  ;;  %v1477_v59 = vmul.f32 %v3445_v47, %v1476_v4 }
 0x152   : > { %v1602_v44 = vstv %s3459_s11  ;;  %v1624_v62 = vstv %s3490_s10 }
 0x153   : > { %v1380_v19 = vadd.f32 %v1379_v29, %v1343_v3  ;;  %v1376_v35 = vadd.f32 %v1375_v1, %v1330_v5  ;;  %v1481_v36 = vrot.slane %v1477_v59, 1  ;;  %v1603_v0 = vmul.f32 %v3445_v47, %v1602_v44 }
 0x154   : > { %v3370_v57 = vpop.permute.xlu1 %1366  ;;  %v3375_v11 = vpop.permute.xlu0 %1353  ;;  %v1494_v1 = vsel %vm320_vm0, %v1492_v24, %v1493_v28  ;;  %v1625_v5 = vmul.f32 %v3445_v47, %v1624_v62 }
 0x155   : > { %v1369_v40 = vadd.f32 %v3370_v57, %v1317_v8  ;;  %v1356_v53 = vadd.f32 %v3375_v11, %v1304_v10  ;;  %v1614_v57 = vmul.f32 %v3445_v47, %v1613_v52  ;;  %v1483_v38 = vsel %vm320_vm0, %v1481_v36, %v1482_v46 }
 0x156   : > { %v1607_v9 = vrot.slane %v1603_v0, 2 }
 0x157   : > { %v1388_v29 = vadd.f32 %v1387_v31, %v1369_v40  ;;  %v1618_v61 = vrot.slane %v1614_v57, 2  ;;  %v1629_v40 = vrot.slane %v1625_v5, 2 }
 0x158   : > { %v3387_v13 = vpop.permute.xlu1 %1401  ;;  %v3394_v23 = vpop.permute.xlu0 %1393 }
 0x159   : > { %v1404_v42 = vadd.f32 %v3387_v13, %v1380_v19  ;;  %v1396_v43 = vadd.f32 %v3394_v23, %v1376_v35  ;;  %v1384_v13 = vadd.f32 %v1383_v21, %v1356_v53  ;;  %v1472_v23 = vsel %vm320_vm0, %v1470_v14, %v1471_v34 }
 0x15a   : > { %v1620_v33 = vsel %vm469_vm1, %v1618_v61, %v1619_v60  ;;  %v1640_v14 = vrot.slane %v1636_v20, 2 }
 0x15c   : > { %v3408_v32 = vpop.permute.xlu1 %1417  ;;  %v3412_v63 = vpop.permute.xlu0 %1409 }
 0x15d   : > { %v1420_v41 = vadd.f32 %v3408_v32, %v1388_v29  ;;  %v1412_v58 = vadd.f32 %v3412_v63, %v1384_v13 }
 0x160   : > { %v3426_v45 = vpop.permute.xlu1 %1433  ;;  %v3432_v50 = vpop.permute.xlu0 %1425 }
 0x161   : > { %v1436_v49 = vadd.f32 %v3426_v45, %v1404_v42  ;;  %v1428_v54 = vadd.f32 %v3432_v50, %v1396_v43  ;;  %v1604_v45 = vmul.f32 %v3055_v15, %v1602_v44  ;;  %v2194_v15 = vld [vmem:[%s2473_s25 + $0x38] sm:$0x3]  ;;  %s212_s25 = sand.u32 1, %s2303_s13  }
 0x162   : > { %v1637_v4 = vmul.f32 %v2194_v15, %v1635_v56  ;;  %v1626_v21 = vmul.f32 %v2194_v15, %v1624_v62  ;;  %s1923_s1 = sshll.u32 %s212_s25, 5  ;;  %s3541_s28 = scalar_lea.sflag [#allocation3], %s212_s25 }
 0x163   : > { %v1474_v51 = vadd.f32 %v1472_v23, %v1436_v49  ;;  %v1463_v3 = vadd.f32 %v1461_v55, %v1428_v54  ;;  %v1608_v30 = vrot.slane %v1604_v45, 2  ;;  %s214_s9 = scalar_lea.vmem [#allocation7], %s1923_s1 }
 0x164   : > { %v3449_v48 = vpop.permute.xlu1 %1449  ;;  %v3453_v18 = vpop.permute.xlu0 %1441  ;;  %v1641_v59 = vrot.slane %v1637_v4, 2  ;;  %v1630_v19 = vrot.slane %v1626_v21, 2  ;;  %s1808_s0 = sshll.u32 %s214_s9, 4  ;;  %s3529_s0 = int_to_ptr.vmem [resolvable:$true] %s1808_s0 }
 0x165   : > { %v1452_v50 = vadd.f32 %v3449_v48, %v1420_v41  ;;  %v1444_v32 = vadd.f32 %v3453_v18, %v1412_v58  ;;  %s2225_s30 = scalar_lea.vmem %s3529_s0, 512  ;;  %p2232_p7 = scmp.lt.s32.totalorder %s3529_s0, %s2230_s2 }
 0x166   : > { %v1642_v44 = vsel %vm469_vm1, %v1640_v14, %v1641_v59  ;;  %v1631_v24 = vsel %vm469_vm1, %v1629_v40, %v1630_v19  ;;  %p2226_p10 = scmp.ne.s32.totalorder %s3529_s0, %s2225_s30  ;;  %p2233_p9 = scmp.lt.s32.totalorder %s2231_s4, %s2225_s30 }
 0x167   : > { %v1496_v8 = vadd.f32 %v1494_v1, %v1452_v50  ;;  %v1485_v18 = vadd.f32 %v1483_v38, %v1444_v32 }
 0x168   : > { %v3468_v22 = vpop.permute.xlu1 %1519  ;;  %v3473_v16 = vpop.permute.xlu0 %1506  ;;  %p2227_p0 = pnand %p2226_p10, %p3619_p12  ;;  %p2234_p11 = por %p2233_p9, %p2232_p7 }
 0x169   : > { %v1522_v63 = vadd.f32 %v3468_v22, %v1474_v51  ;;  %v1509_v6 = vadd.f32 %v3473_v16, %v1463_v3  ;;  %v1609_v22 = vsel %vm469_vm1, %v1607_v9, %v1608_v30 }
 0x16a   : > { %p2228_p2 = pneg %p2227_p0 }
 0x16c   : > { %v3486_v17 = vpop.permute.xlu1 %1545  ;;  %v1533_v26 = vpop.permute.xlu0 %1532  ;;  %p2235_p13 = pnand %p2234_p11, %p2228_p2 }
 0x16d   : > { %v1548_v2 = vadd.f32 %v3486_v17, %v1496_v8  ;;  %v1535_v47 = vadd.f32 %v1533_v26, %v1485_v18 }
 0x170   : > { %v1572_v37 = vpop.permute.xlu1 %1571  ;;  %v1559_v11 = vpop.permute.xlu0 %1558 }
 0x171   : > { %v1574_v12 = vadd.f32 %v1572_v37, %v1522_v63  ;;  %v1561_v10 = vadd.f32 %v1559_v11, %v1509_v6 }
 0x173   : > { %v1622_v25 = vadd.f32 %v1620_v33, %v1574_v12  ;;  %v1611_v27 = vadd.f32 %v1609_v22, %v1561_v10 }
 0x174   : > { %v1598_v31 = vpop.permute.xlu1 %1597  ;;  %v1585_v39 = vpop.permute.xlu0 %1584 }
 0x175   : > { %v1600_v16 = vadd.f32 %v1598_v31, %v1548_v2  ;;  %v1587_v35 = vadd.f32 %v1585_v39, %v1535_v47 }
 0x177   : > { %v1644_v43 = vadd.f32 %v1642_v44, %v1600_v16  ;;  %v1633_v26 = vadd.f32 %v1631_v24, %v1587_v35 }
 0x178   : > { %v1668_v48 = vpop.permute.xlu1 %1667  ;;  %v1655_v52 = vpop.permute.xlu0 %1654 }
 0x179   : > { %v1670_v42 = vadd.f32 %v1668_v48, %v1622_v25  ;;  %v1657_v28 = vadd.f32 %v1655_v52, %v1611_v27 }
 0x17c   : > { %v1694_v34 = vpop.permute.xlu1 %1693  ;;  %v1681_v53 = vpop.permute.xlu0 %1680 }
 0x17d   : > { %v1696_v57 = vadd.f32 %v1694_v34, %v1644_v43  ;;  %v1683_v29 = vadd.f32 %v1681_v53, %v1633_v26 }
 0x180   : > { %v1720_v17 = vpop.permute.xlu1 %1719  ;;  %v1707_v46 = vpop.permute.xlu0 %1706 }
 0x181   : > { %v1722_v36 = vadd.f32 %v1720_v17, %v1670_v42  ;;  %v1709_v37 = vadd.f32 %v1707_v46, %v1657_v28 }
 0x183   : > { %v1761_v49 = vmul.f32 0.01, %v1722_v36  ;;  %v1750_v7 = vmul.f32 0.01, %v1709_v37  ;;  %vm1760_vm2 = vcmp.ge.f32.partialorder %v1722_v36, 0.0  ;;  %vm1749_vm3 = vcmp.ge.f32.partialorder %v1709_v37, 0.0 }
 0x184   : > { %v1746_v11 = vpop.permute.xlu1 %1745  ;;  %v1733_v13 = vpop.permute.xlu0 %1732 }
 0x185   : > { %v1748_v0 = vadd.f32 %v1746_v11, %v1696_v57  ;;  %v1735_v54 = vadd.f32 %v1733_v13, %v1683_v29  ;;  %v1762_v41 = vsel %vm1760_vm2, %v1722_v36, %v1761_v49  ;;  %v1751_v58 = vsel %vm1749_vm3, %v1709_v37, %v1750_v7 }
 0x187   : > { %v1783_v23 = vmul.f32 0.01, %v1748_v0  ;;  %v1772_v1 = vmul.f32 0.01, %v1735_v54  ;;  %vm1782_vm5 = vcmp.ge.f32.partialorder %v1748_v0, 0.0  ;;  %vm1771_vm6 = vcmp.ge.f32.partialorder %v1735_v54, 0.0 }
 0x188   : > { %v1766_v55 = vpop.permute.xlu1 %1765  ;;  %v1755_v56 = vpop.permute.xlu0 %1754 }
 0x189   : > { %v1768_v45 = vadd.f32 %v1766_v55, %v1762_v41  ;;  %v1757_v38 = vadd.f32 %v1755_v56, %v1751_v58  ;;  %v1784_v61 = vsel %vm1782_vm5, %v1748_v0, %v1783_v23  ;;  %v1773_v51 = vsel %vm1771_vm6, %v1735_v54, %v1772_v1 }
 0x18b   : > { %2080 = vst.msk [vmem:[%s214_s9 + $0x8] sm:$0xff] %vm1758_vm4, %v1768_v45  ;;  %1759 = vst.msk [vmem:[%s214_s9] sm:$0xff] %vm1758_vm4, %v1757_v38 }
 0x18c   : > { %v1788_v31 = vpop.permute.xlu1 %1787  ;;  %v1777_v50 = vpop.permute.xlu0 %1776 }
 0x18d   : > { %v1790_v62 = vadd.f32 %v1788_v31, %v1784_v61  ;;  %v1779_v39 = vadd.f32 %v1777_v50, %v1773_v51 }
 0x18f   : > { %2084 = vst.msk [vmem:[%s214_s9 + $0x18] sm:$0xff] %vm1758_vm4, %v1790_v62  ;;  %2082 = vst.msk [vmem:[%s214_s9 + $0x10] sm:$0xff] %vm1758_vm4, %v1779_v39 }
 0x190   : > { %2238 = shalt.err (!%p2235_p13)
}
 0x191   : > { %s2239_s29 = scalar_lea.hbm %s3535_s24, 512  ;;  %s2243_s7 = scalar_lea.hbm %s3596_s3, 2048 }
 0x192   : > { %p2240_p1 = scmp.ne.s32.totalorder %s3535_s24, %s2239_s29  ;;  %p2244_p6 = scmp.lt.u32.totalorder %s3535_s24, %s3596_s3 }
 0x193   : > { %p2245_p3 = scmp.lt.u32.totalorder %s2243_s7, %s2239_s29  ;;  %p2247_p10 = scmp.lt.u32.totalorder %s2239_s29, %s3535_s24 }
 0x194   : > { %p2241_p4 = pnand %p2240_p1, %p3619_p12 }
 0x195   : > { %p2246_p8 = por %p2245_p3, %p2244_p6 }
 0x196   : > { %p2242_p5 = pneg %p2241_p4 }
 0x197   : > { %p2248_p0 = por %p2247_p10, %p2246_p8 }
 0x199   : > { %p2249_p2 = pnand %p2248_p0, %p2242_p5 }
 0x19b   : > { %2252 = shalt.err (!%p2249_p2)
}
 0x19c   : > { %s2334_s21 = smov 128   ;;  %s2335_s1 = smov 256  }
 0x19d   : > { %s2336_s20 = smov 8  }
 0x19e   : > { %2098 = dma.vmem_to_hbm [thread:$0]  (%p3619_p12), %s3529_s0, 512, %s3535_s24, %s3541_s28, %s2334_s21, %s2335_s1, %s2336_s20  }
 0x19f PF: > { %p2115_p7 = scmp.ge.s32.totalorder %s2327_s19, 2  ;;  %s1823_s9 = sand.u32 1, %s2299_s12  }
 0x1a0   : > { %p3620_p9 = scmp.ne.s32.totalorder %s3609_s27, 0  ;;  %s1824_s16 = scalar_lea.sflag [#allocation3], %s1823_s9 }
 0x1a2   : > { %p2108_p11 = pnand %p2115_p7, %p3620_p9 }
 0x1a4   : > { %2294 = dma.done.wait (!%p2108_p11), %s1824_s16, 512  }
 0x1a5   : > { %2296 = vsyncadd (!%p2108_p11), %s1824_s16, 4294966784  ;;  %s18_s19 = sadd.s32 1, %s2327_s19   ;;  %s3621_s26 = sld [smem:[#allocation11_spill]] }
 0x1a6   : > { %p15_p13 = scmp.ge.s32.totalorder %s18_s19, 6   ;;  %s3622_s12 = smov %s2303_s13 }
 0x1a7   : > { %s3623_s13 = smov %s2307_s14  ;;  %s3624_s14 = smov %s2439_s8 }
 0x1a8   : > { %s3625_s15 = smov %s2319_s17  ;;  %s3626_s16 = smov %s2323_s18 }
 0x1a9   : > { %s3627_s17 = smov %s3630_s22  ;;  %17 = sbr.rel (!%p15_p13) target bundleno = 11 (0xb), region = 82 }
 0x1ab   : > { %s3628_s18 = smov %s3621_s26 }
 0x1b0   :  { %1829 = vsyncpa [#allocation3], 1 }
 0x1b1   :  { %1831 = vsyncpa [#allocation3 + $0x1], 1 }
 0x1b2   :  { %1832 = vsyncpa [#allocation4], 1 }
 0x1b3   :  { %1834 = vsyncpa [#allocation4 + $0x1], 1 }
 0x1b4   :  { %1835 = vsyncpa [#allocation6], 1 }

</bundles_post_ra>
